<compile_context>
chip_gen: v7x
topology: tpu7x:2x2x1
jax: 0.10.0
libtpu: 0.0.40
codegen_flags: <defaults>
</compile_context>

<pallas_src>
import functools
import math

import jax
import jax.numpy as jnp
from jax.experimental import pallas as pl
from jax.experimental.pallas import tpu as pltpu


def _round_up(x, m):
    return (x + m - 1) // m * m


def glove_kernel(pk_ref, g_ref, out_ref, acc_ref, *, alpha, log_x_max, tn, vpad):
    n = pl.program_id(1)  # reduction step within this parallel slice

    @pl.when(n == 0)
    def _():
        acc_ref[...] = jnp.zeros_like(acc_ref)

    # One packed, lane-dense row per step: [ i | j | bits(x) | mask ], int32.
    i_row = pk_ref[0, :, 0 * tn:1 * tn]                                # (1, tn) int32
    j_row = pk_ref[0, :, 1 * tn:2 * tn]                                # (1, tn) int32
    x_row = pltpu.bitcast(pk_ref[0, :, 2 * tn:3 * tn], jnp.float32)    # (1, tn) f32
    mask = pk_ref[0, :, 3 * tn:4 * tn].astype(jnp.float32)             # (1, tn) f32

    # One-hots with the vocab on the SUBLANE axis and samples on the LANE
    # axis, so every downstream (1, tn) quantity is lane-dense.
    vocab_ids = jax.lax.broadcasted_iota(jnp.int32, (vpad, tn), 0)
    onehot_i = (i_row == vocab_ids).astype(jnp.float32)                # (vpad, tn)
    onehot_j = (j_row == vocab_ids).astype(jnp.float32)                # (vpad, tn)

    # t[v, k] = G[v, j_k];  dot_bias[k] = G[i_k, j_k]
    #         = sum(w_i * w~_j) + bias_i + bias~_j      (exact f32 gathers)
    t = jnp.dot(g_ref[...], onehot_j, preferred_element_type=jnp.float32)  # (vpad, tn)
    dot_bias = jnp.sum(onehot_i * t, axis=0, keepdims=True)                # (1, tn)

    # log(x) is computed once and reused for the error term AND the weighting
    # function.  x must be > 0 (true for GloVe co-occurrence counts); padded
    # samples use x = 1 and are zeroed out by the mask.
    log_x = jnp.log(x_row)
    wf = jnp.minimum(jnp.exp(alpha * (log_x - log_x_max)), 1.0)
    err = dot_bias - log_x
    acc_ref[...] += (mask * wf) * (err * err)

    # Last reduction step: reduce the lane-dense accumulator to this slice's
    # partial sum.  (One tiny masked store, once per slice -- negligible.)
    @pl.when(n == pl.num_programs(1) - 1)
    def _():
        out_ref[...] = jnp.sum(acc_ref[...], keepdims=True).reshape(1, 1, 1)


def glove_loss(i, j, x, weight, weight_tilde, bias, bias_tilde,
               *, x_max, alpha=0.75, tn=2048, num_parallel=1):
    """Scalar GloVe loss matching GloVe.forward(i, j, x)."""
    assert tn % 128 == 0, "tn must be a multiple of 128 (lane width)"
    N = int(i.shape[0])
    V, _ = weight.shape

    # --- Gram-matrix precompute (exact f32) ---------------------------------
    # TODO(synk): for production-scale vocab (V >~ 2-3K) the V x V Gram matrix
    # no longer fits VMEM; switch to scalar-prefetched indices + a manual DMA
    # row-gather of the embedding tables from HBM.
    ones = jnp.ones((V, 1), jnp.float32)
    w_aug = jnp.concatenate(
        [weight.astype(jnp.float32), bias.reshape(V, 1).astype(jnp.float32), ones], axis=1)
    wt_aug = jnp.concatenate(
        [weight_tilde.astype(jnp.float32), ones, bias_tilde.reshape(V, 1).astype(jnp.float32)], axis=1)
    gram = w_aug @ wt_aug.T                                    # (V, V) f32
    vpad = _round_up(V, 128)
    gram = jnp.pad(gram, ((0, vpad - V), (0, vpad - V)))       # lane/sublane aligned

    # --- Pack i / j / x / mask into one lane-dense int32 stream -------------
    n_pad = _round_up(max(N, 1), num_parallel * tn)
    steps = n_pad // (num_parallel * tn)
    total = num_parallel * steps

    def pad_to(a, fill, dtype):
        a = a.astype(dtype)
        if n_pad > N:
            a = jnp.concatenate([a, jnp.full((n_pad - N,), fill, dtype)])
        return a

    i_p = pad_to(i, 0, jnp.int32).reshape(total, tn)
    j_p = pad_to(j, 0, jnp.int32).reshape(total, tn)
    x_bits = jax.lax.bitcast_convert_type(
        pad_to(x, 1.0, jnp.float32), jnp.int32).reshape(total, tn)
    m_p = pad_to(jnp.ones((N,), jnp.int32), 0, jnp.int32).reshape(total, tn)
    packed = jnp.concatenate([i_p, j_p, x_bits, m_p], axis=1)  # (total, 4*tn)
    packed = packed.reshape(total, 1, 4 * tn)                  # keep last-2 dims aligned

    kernel = functools.partial(
        glove_kernel, alpha=float(alpha), log_x_max=float(math.log(x_max)),
        tn=tn, vpad=vpad)

    # Tight VMEM budget (no 4x fudge): resident Gram (double-buffered by the
    # pipeline), packed-stream double buffer, accumulator, and the (vpad, tn)
    # f32 intermediates; capped well below v7x's 64 MiB physical VMEM.
    vmem_est = (2 * vpad * vpad * 4        # Gram double-buffer
                + 2 * 4 * tn * 4           # packed (1, 1, 4*tn) double-buffer
                + tn * 4                   # accumulator
                + 3 * vpad * tn * 4        # onehot_i / onehot_j / t
                + 8 * tn * 4)              # (1, tn) loss-chain temporaries
    vmem_limit = int(min(2 * vmem_est + (4 << 20), 32 << 20))

    out = pl.pallas_call(
        kernel,
        out_shape=jax.ShapeDtypeStruct((num_parallel, 1, 1), jnp.float32),
        grid_spec=pltpu.PrefetchScalarGridSpec(
            num_scalar_prefetch=0,
            grid=(num_parallel, steps),
            in_specs=[
                # packed [i|j|x|mask] stream: one dense DMA per step
                pl.BlockSpec((1, 1, 4 * tn), lambda c, n: (c * steps + n, 0, 0)),
                # Gram matrix: constant block index -> fetched once, resident
                pl.BlockSpec((vpad, vpad), lambda c, n: (0, 0)),
            ],
            out_specs=pl.BlockSpec((1, 1, 1), lambda c, n: (c, 0, 0)),
            scratch_shapes=[pltpu.VMEM((1, tn), jnp.float32)]),  # lane-dense accumulator
        compiler_params=pltpu.CompilerParams(
            dimension_semantics=("parallel", "arbitrary"),
            vmem_limit_bytes=vmem_limit),
    )(packed, gram)

    return jnp.sum(out) / N


def glove_loss_ref(i, j, x, weight, weight_tilde, bias, bias_tilde,
                   *, x_max, alpha=0.75):
    """Pure-JAX reference of GloVe.forward for verification."""
    wi = weight[i]
    wj = weight_tilde[j]
    loss = jnp.sum(wi * wj, axis=1) + bias[i] + bias_tilde[j] - jnp.log(x)
    wf = jnp.clip((x / x_max) ** alpha, 0.0, 1.0)
    return jnp.mean(wf * jnp.square(loss))


if __name__ == "__main__":
    # Small, deterministic synthetic setup (equivalent of GloVe.__init__).
    vocab_size = 64
    embedding_size = 32
    x_max = 100.0
    alpha = 0.75
    N = 4000  # deliberately NOT a multiple of tn -> exercises the mask path

    key = jax.random.PRNGKey(0)
    k_w, k_wt, k_b, k_bt, k_i, k_j, k_x = jax.random.split(key, 7)

    weight = jax.random.normal(k_w, (vocab_size, embedding_size), jnp.float32)
    weight_tilde = jax.random.normal(k_wt, (vocab_size, embedding_size), jnp.float32)
    bias = jax.random.normal(k_b, (vocab_size,), jnp.float32)
    bias_tilde = jax.random.normal(k_bt, (vocab_size,), jnp.float32)

    i = jax.random.randint(k_i, (N,), 0, vocab_size, jnp.int32)
    j = jax.random.randint(k_j, (N,), 0, vocab_size, jnp.int32)
    x = jax.random.uniform(k_x, (N,), jnp.float32, 1.0, 200.0)  # positive counts

    ref = glove_loss_ref(i, j, x, weight, weight_tilde, bias, bias_tilde,
                         x_max=x_max, alpha=alpha)

    # Single-core path (v5e / v6e default): exact f32, tight tolerance.
    loss1 = glove_loss(i, j, x, weight, weight_tilde, bias, bias_tilde,
                       x_max=x_max, alpha=alpha, tn=1024, num_parallel=1)
    loss1 = jax.block_until_ready(loss1)
    assert jnp.allclose(loss1, ref, rtol=1e-4, atol=1e-4), (loss1, ref)

    # Two-slice reduction path (for 2-TensorCore v7x); still correct on 1-TC chips.
    loss2 = glove_loss(i, j, x, weight, weight_tilde, bias, bias_tilde,
                       x_max=x_max, alpha=alpha, tn=512, num_parallel=2)
    loss2 = jax.block_until_ready(loss2)
    assert jnp.allclose(loss2, ref, rtol=1e-4, atol=1e-4), (loss2, ref)

    print("KERNEL_OK")
</pallas_src>

<mosaic_0001>
module attributes {stable_mosaic.version = 11 : i64} {
  func.func @glove_kernel(%arg0: i32, %arg1: i32, %arg2: memref<1x1x4096xi32, #tpu.memory_space<vmem>>, %arg3: memref<128x128xf32, #tpu.memory_space<vmem>>, %arg4: memref<1x1x1xf32, #tpu.memory_space<vmem>>, %arg5: memref<1x1024xf32, #tpu.memory_space<vmem>>) attributes {dimension_semantics = [#tpu.dimension_semantics<parallel>, #tpu.dimension_semantics<arbitrary>], iteration_bounds = array<i64: 1, 4>, scalar_prefetch = 0 : i64, scratch_operands = 1 : i64, tpu.core_type = #tpu.core_type<tc>, window_params = [{transform_indices = @transform_0, window_bounds = array<i64: 1, 1, 4096>}, {pipeline_mode = #tpu.pipeline_mode<synchronous>, transform_indices = @transform_1, window_bounds = array<i64: 128, 128>}, {transform_indices = @transform_2, window_bounds = array<i64: 1, 1, 1>}]} {
    %c0_i32 = arith.constant 0 : i32
    %0 = arith.cmpi eq, %arg1, %c0_i32 : i32
    %1 = arith.extui %0 : i1 to i32
    %c0_i32_0 = arith.constant 0 : i32
    %2 = arith.cmpi ne, %1, %c0_i32_0 : i32
    scf.if %2 {
      %cst_20 = arith.constant 0.000000e+00 : f32
      %45 = vector.broadcast %cst_20 : f32 to vector<1x1024xf32>
      %c0_21 = arith.constant 0 : index
      %c0_22 = arith.constant 0 : index
      %46 = vector.load %arg5[%c0_21, %c0_22] : memref<1x1024xf32, #tpu.memory_space<vmem>>, vector<1x1024xf32>
      tpu.vector_store %arg5[%c0_21, %c0_22], %45 {strides = array<i32>} : memref<1x1024xf32, #tpu.memory_space<vmem>>, vector<1x1024xf32>,
    } else {
    }
    %c0 = arith.constant 0 : index
    %c0_1 = arith.constant 0 : index
    %c0_2 = arith.constant 0 : index
    %3 = vector.load %arg2[%c0, %c0_1, %c0_2] : memref<1x1x4096xi32, #tpu.memory_space<vmem>>, vector<1x1x1024xi32>
    %4 = vector.shape_cast %3 : vector<1x1x1024xi32> to vector<1x1024xi32>
    %c0_3 = arith.constant 0 : index
    %c0_4 = arith.constant 0 : index
    %c1024 = arith.constant 1024 : index
    %5 = vector.load %arg2[%c0_3, %c0_4, %c1024] : memref<1x1x4096xi32, #tpu.memory_space<vmem>>, vector<1x1x1024xi32>
    %6 = vector.shape_cast %5 : vector<1x1x1024xi32> to vector<1x1024xi32>
    %c0_5 = arith.constant 0 : index
    %c0_6 = arith.constant 0 : index
    %c2048 = arith.constant 2048 : index
    %7 = vector.load %arg2[%c0_5, %c0_6, %c2048] : memref<1x1x4096xi32, #tpu.memory_space<vmem>>, vector<1x1x1024xi32>
    %8 = vector.shape_cast %7 : vector<1x1x1024xi32> to vector<1x1024xi32>
    %9 = tpu.bitcast %8 : vector<1x1024xi32> -> vector<1x1024xf32>
    %c0_7 = arith.constant 0 : index
    %c0_8 = arith.constant 0 : index
    %c3072 = arith.constant 3072 : index
    %10 = vector.load %arg2[%c0_7, %c0_8, %c3072] : memref<1x1x4096xi32, #tpu.memory_space<vmem>>, vector<1x1x1024xi32>
    %11 = vector.shape_cast %10 : vector<1x1x1024xi32> to vector<1x1024xi32>
    %12 = arith.sitofp %11 : vector<1x1024xi32> to vector<1x1024xf32>
    %13 = tpu.iota {dimensions = array<i32: 0>} : vector<128x1024xi32>
    %14 = vector.broadcast %4 : vector<1x1024xi32> to vector<128x1024xi32>
    %15 = arith.cmpi eq, %14, %13 : vector<128x1024xi32>
    %16 = arith.extui %15 : vector<128x1024xi1> to vector<128x1024xi32>
    %17 = arith.sitofp %16 : vector<128x1024xi32> to vector<128x1024xf32>
    %18 = vector.broadcast %6 : vector<1x1024xi32> to vector<128x1024xi32>
    %19 = arith.cmpi eq, %18, %13 : vector<128x1024xi32>
    %20 = arith.extui %19 : vector<128x1024xi1> to vector<128x1024xi32>
    %21 = arith.sitofp %20 : vector<128x1024xi32> to vector<128x1024xf32>
    %c0_9 = arith.constant 0 : index
    %c0_10 = arith.constant 0 : index
    %22 = vector.load %arg3[%c0_9, %c0_10] : memref<128x128xf32, #tpu.memory_space<vmem>>, vector<128x128xf32>
    %cst = arith.constant dense<0.000000e+00> : vector<128x1024xf32>
    %23 = tpu.matmul %22, %21, %cst {dimension_numbers = #tpu.dot_dimension_numbers<[1], [0], [0], [1], [0, 0, 1, 1], [], []>} : vector<128x128xf32>, vector<128x1024xf32>, vector<128x1024xf32> -> vector<128x1024xf32>
    %24 = arith.mulf %17, %23 : vector<128x1024xf32>
    %cst_11 = arith.constant dense<0.000000e+00> : vector<1024xf32>
    %25 = vector.multi_reduction <add>, %24, %cst_11 [0] : vector<128x1024xf32> to vector<1024xf32>
    %26 = vector.shape_cast %25 : vector<1024xf32> to vector<1x1024xf32>
    %27 = math.log %9 : vector<1x1024xf32>
    %cst_12 = arith.constant 4.60517025 : f32
    %28 = vector.broadcast %cst_12 : f32 to vector<1x1024xf32>
    %29 = arith.subf %27, %28 : vector<1x1024xf32>
    %cst_13 = arith.constant 7.500000e-01 : f32
    %30 = vector.broadcast %cst_13 : f32 to vector<1x1024xf32>
    %31 = arith.mulf %30, %29 : vector<1x1024xf32>
    %32 = math.exp %31 : vector<1x1024xf32>
    %cst_14 = arith.constant 1.000000e+00 : f32
    %33 = vector.broadcast %cst_14 : f32 to vector<1x1024xf32>
    %34 = arith.minimumf %32, %33 : vector<1x1024xf32>
    %35 = arith.subf %26, %27 : vector<1x1024xf32>
    %c0_15 = arith.constant 0 : index
    %c0_16 = arith.constant 0 : index
    %36 = vector.load %arg5[%c0_15, %c0_16] : memref<1x1024xf32, #tpu.memory_space<vmem>>, vector<1x1024xf32>
    %37 = arith.mulf %12, %34 : vector<1x1024xf32>
    %38 = arith.mulf %35, %35 : vector<1x1024xf32>
    %39 = arith.mulf %37, %38 : vector<1x1024xf32>
    %40 = arith.addf %36, %39 : vector<1x1024xf32>
    %c0_17 = arith.constant 0 : index
    %c0_18 = arith.constant 0 : index
    %41 = vector.load %arg5[%c0_17, %c0_18] : memref<1x1024xf32, #tpu.memory_space<vmem>>, vector<1x1024xf32>
    tpu.vector_store %arg5[%c0_17, %c0_18], %40 {strides = array<i32>} : memref<1x1024xf32, #tpu.memory_space<vmem>>, vector<1x1024xf32>,
    %c3_i32 = arith.constant 3 : i32
    %42 = arith.cmpi eq, %arg1, %c3_i32 : i32
    %43 = arith.extui %42 : i1 to i32
    %c0_i32_19 = arith.constant 0 : i32
    %44 = arith.cmpi ne, %43, %c0_i32_19 : i32
    scf.if %44 {
      %c0_20 = arith.constant 0 : index
      %c0_21 = arith.constant 0 : index
      %45 = vector.load %arg5[%c0_20, %c0_21] : memref<1x1024xf32, #tpu.memory_space<vmem>>, vector<1x1024xf32>
      %46 = vector.shape_cast %45 : vector<1x1024xf32> to vector<1x1x1024xf32>
      %cst_22 = arith.constant dense<0.000000e+00> : vector<1xf32>
      %47 = vector.multi_reduction <add>, %46, %cst_22 [1, 2] : vector<1x1x1024xf32> to vector<1xf32>
      %48 = vector.shape_cast %47 : vector<1xf32> to vector<1x1x1xf32>
      %49 = vector.extract %48[0, 0, 0] : f32 from vector<1x1x1xf32>
      %50 = vector.broadcast %49 : f32 to vector<1x1xf32>
      %51 = vector.shape_cast %50 : vector<1x1xf32> to vector<1x1x1xf32>
      %c0_23 = arith.constant 0 : index
      %c0_24 = arith.constant 0 : index
      %c0_25 = arith.constant 0 : index
      %52 = vector.load %arg4[%c0_23, %c0_24, %c0_25] : memref<1x1x1xf32, #tpu.memory_space<vmem>>, vector<1x1x1xf32>
      tpu.vector_store %arg4[%c0_23, %c0_24, %c0_25], %51 {strides = array<i32>} : memref<1x1x1xf32, #tpu.memory_space<vmem>>, vector<1x1x1xf32>,
    } else {
    }
    return
  }
  func.func @transform_0(%arg0: i32, %arg1: i32) -> (i32, i32, i32) {
    %c4_i32 = arith.constant 4 : i32
    %0 = arith.muli %arg0, %c4_i32 : i32
    %1 = arith.addi %0, %arg1 : i32
    %c0_i32 = arith.constant 0 : i32
    %c0_i32_0 = arith.constant 0 : i32
    %c0_i32_1 = arith.constant 0 : i32
    return %1, %c0_i32, %c0_i32_0 : i32, i32, i32
  }
  func.func @transform_1(%arg0: i32, %arg1: i32) -> (i32, i32) {
    %c0_i32 = arith.constant 0 : i32
    %c0_i32_0 = arith.constant 0 : i32
    %c0_i32_1 = arith.constant 0 : i32
    return %c0_i32, %c0_i32_0 : i32, i32
  }
  func.func @transform_2(%arg0: i32, %arg1: i32) -> (i32, i32, i32) {
    %c0_i32 = arith.constant 0 : i32
    %c0_i32_0 = arith.constant 0 : i32
    %c0_i32_1 = arith.constant 0 : i32
    return %arg0, %c0_i32, %c0_i32_0 : i32, i32, i32
  }
}

</mosaic_0001>

<bundles_post_ra>
// kernel: tpu_custom_call.1
= control target key start
LH: loop header
LB: loop body
LE: loop exit
PB: predicated region body
PF: predicated region fallthrough
CT: control target
= control target key end

     0   :  { %7 = vsyncpa [#allocation4], 0  ;;  %s5043_s0 = inlined_call_operand.hbm [shape: s32[4,1,4096], index: 0, kind: input, shape index: {}]   ;;  %s5044_s1 = inlined_call_operand.hbm [shape: f32[128,128], index: 1, kind: input, shape index: {}]   ;;  %s5045_s2 = inlined_call_operand.hbm [shape: f32[1,1,1], index: 2, kind: output, shape index: {}]  }
   0x1   :  { %9 = vsyncpa [#allocation4 + $0x1], 0 }
   0x2   :  { %10 = vsyncpa [#allocation7], 0 }
   0x3   :  { %11 = vsyncpa [#allocation5], 0  ;;  %s3210_s9 = smov 0   ;;  %s3212_s10 = smov 0  }
   0x4   :  { %s3214_s11 = smov 0   ;;  %s3216_s12 = smov 0  }
   0x5   :  { %s3218_s13 = smov 0   ;;  %s3220_s14 = smov 0  }
   0x6 LB: > { %s2392_s15 = sadd.s32 4294967295, %s3184_s14   ;;  %p53_p0 = scmp.ne.s32.totalorder %s3168_s10, %s3164_s9  ;;  %s3184_s14 = sphi %s3220_s14, %s17_s14   ;;  %s3180_s13 = sphi %s3218_s13, %s5229_s13   ;;  %s3176_s12 = sphi %s3216_s12, %s5228_s12   ;;  %s3172_s11 = sphi %s3214_s11, %s5227_s11   ;;  %s3168_s10 = sphi %s3212_s10, %s5226_s10   ;;  %s3164_s9 = sphi %s3210_s9, %s5225_s9  }
   0x7   : > { %p3242_p1 = scmp.eq.s32.totalorder %s2392_s15, 0  ;;  %p2393_p2 = scmp.ge.s32.totalorder %s3184_s14, 1 }
   0x8   : > { %p111_p3 = scmp.lt.s32.totalorder %s3184_s14, 5  ;;  %s3186_s19 = smov [#allocation6]  }
   0x9   : > { %s5084_s16 = scalar_select %p3242_p1, 1, 0 }
   0xa   : > { %p3250_p4 = por %p3242_p1, %p53_p0  ;;  %p3254_p5 = pnand %p2393_p2, %p111_p3 }
   0xb   : > { %s123_s20 = sshll.u32 %s3186_s19, 4  ;;  %s26_s22 = sadd.s32 1, %s3180_s13  ;;  %s124_s20 = int_to_ptr.vmem [resolvable:$true] %s123_s20 }
   0xc   : > { %s5085_s17 = scalar_select %p3250_p4, 1, 0 }
   0xd   : > { %s5086_s18 = scalar_select %p3254_p5, 1, 0 }
   0xe   : > { %p2941_p6 = pneg %p3254_p5  ;;  %s3042_s25 = scalar_lea.hbm %s5044_s1, 2048 }
   0xf   : > { %p3043_p8 = scmp.ne.s32.totalorder %s5044_s1, %s3042_s25  ;;  %p3049_p12 = scmp.lt.u32.totalorder %s3042_s25, %s5044_s1 }
  0x10   : > { %p3262_p7 = pnand %p2941_p6, %p3242_p1 }
  0x12   : > { %p3044_p9 = pneg %p3262_p7 }
  0x14   : > { %p3045_p10 = pnand %p3044_p9, %p3043_p8 }
  0x16   : > { %p3046_p11 = pneg %p3045_p10 }
  0x18   : > { %p3051_p13 = pnand %p3049_p12, %p3046_p11 }
  0x1a   : > { %3054 = shalt.err (!%p3051_p13)
}
  0x1b   : > { %s3055_s30 = scalar_lea.vmem %s124_s20, 2048  ;;  %p3063_p6 = scmp.lt.s32.totalorder %s124_s20, %s124_s20 }
  0x1c   : > { %p3056_p0 = scmp.ne.s32.totalorder %s124_s20, %s3055_s30  ;;  %p3064_p1 = scmp.lt.s32.totalorder %s3055_s30, %s3055_s30 }
  0x1e   : > { %p3058_p2 = pnand %p3056_p0, %p3044_p9  ;;  %p3065_p4 = por %p3064_p1, %p3063_p6 }
  0x20   : > { %p3059_p3 = pneg %p3058_p2 }
  0x22   : > { %p3066_p5 = pnand %p3065_p4, %p3059_p3 }
  0x24   : > { %3069 = shalt.err (!%p3066_p5)
}
  0x25   : > { %s3187_s3 = smov 128   ;;  %s3188_s4 = smov 8  }
  0x26   : > { %2944 = dma.hbm_to_vmem [thread:$0]  (!%p3262_p7), %s5044_s1, 2048, %s124_s20, [#allocation7], %s3187_s3, %s3187_s3, %s3188_s4  }
  0x27   : > { %p27_p1 = scmp.ge.s32.totalorder %s26_s22, 4  ;;  %s40_s7 = sadd.s32 1, %s3172_s11 }
  0x28   : > { %p47_p4 = scmp.ne.s32.totalorder %s3172_s11, %s3168_s10  ;;  %p48_p5 = scmp.eq.s32.totalorder %s3184_s14, 0 }
  0x29   : > { %s5231_s22 = smov (%p27_p1, %s26_s22), 0  ;;  %p2950_p9 = scmp.lt.s32.totalorder %s3184_s14, 4 }
  0x2a   : > { %p49_p8 = por %p48_p5, %p47_p4  ;;  %s37_s8 = ssub.s32 %s3180_s13, %s5231_s22 }
  0x2b   : > { %s137_s9 = sand.u32 1, %s3172_s11   ;;  %p38_p10 = scmp.eq.s32.totalorder %s37_s8, 0 }
  0x2c   : > { %s2396_s19 = sshll.u32 %s137_s9, 5  ;;  %s2800_s23 = sshll.u32 %s3180_s13, 9 }
  0x2d   : > { %s3295_s24 = scalar_select %p38_p10, %s3172_s11, %s40_s7  }
  0x2e   : > { %s3300_s20 = scalar_lea.hbm %s5043_s0, %s2800_s23  ;;  %s141_s26 = scalar_lea.vmem [#allocation3], %s2396_s19 }
  0x2f   : > { %s151_s27 = sshll.u32 %s141_s26, 4  ;;  %p3302_p7 = pnand %p2950_p9, %p49_p8  ;;  %s3306_s27 = int_to_ptr.vmem [resolvable:$true] %s151_s27 }
  0x30   : > { %s138_s29 = scalar_lea.sflag [#allocation4], %s137_s9  ;;  %s3070_s30 = scalar_lea.hbm %s3300_s20, 512 }
  0x31   : > { %p3071_p11 = scmp.ne.s32.totalorder %s3300_s20, %s3070_s30  ;;  %p3072_p12 = pneg %p3302_p7 }
  0x32   : > { %s3075_s5 = scalar_lea.hbm %s5043_s0, 2048  ;;  %p3076_p2 = scmp.lt.u32.totalorder %s3300_s20, %s5043_s0 }
  0x33   : > { %p3073_p13 = pnand %p3072_p12, %p3071_p11  ;;  %p3077_p3 = scmp.lt.u32.totalorder %s3075_s5, %s3070_s30 }
  0x34   : > { %p3079_p1 = scmp.lt.u32.totalorder %s3070_s30, %s3300_s20 }
  0x35   : > { %p3074_p0 = pneg %p3073_p13  ;;  %p3078_p6 = por %p3077_p3, %p3076_p2 }
  0x37   : > { %p3080_p4 = por %p3079_p1, %p3078_p6 }
  0x39   : > { %p3081_p5 = pnand %p3080_p4, %p3074_p0 }
  0x3b   : > { %3084 = shalt.err (!%p3081_p5)
}
  0x3c   : > { %s3085_s8 = scalar_lea.vmem %s3306_s27, 512  ;;  %s3189_s9 = smov [#allocation3]  }
  0x3d   : > { %p3086_p8 = scmp.ne.s32.totalorder %s3306_s27, %s3085_s8  ;;  %s3090_s19 = sshll.u32 %s3189_s9, 4  ;;  %s3091_s19 = int_to_ptr.vmem [resolvable:$false] %s3090_s19 }
  0x3e   : > { %s3092_s23 = scalar_lea.vmem %s3091_s19, 1024  ;;  %p3093_p11 = scmp.lt.s32.totalorder %s3306_s27, %s3091_s19 }
  0x3f   : > { %p3088_p9 = pnand %p3086_p8, %p3072_p12  ;;  %p3094_p13 = scmp.lt.s32.totalorder %s3092_s23, %s3085_s8 }
  0x41   : > { %p3089_p10 = pneg %p3088_p9  ;;  %p3095_p2 = por %p3094_p13, %p3093_p11 }
  0x43   : > { %p3096_p3 = pnand %p3095_p2, %p3089_p10 }
  0x45   : > { %3099 = shalt.err (!%p3096_p3)
}
  0x46   : > { %2948 = dma.hbm_to_vmem [thread:$0]  (!%p3302_p7), %s3300_s20, 512, %s3306_s27, %s138_s29  }
  0x47   : > { %p5089_p0 = scmp.ne.s32.totalorder %s5086_s18, 0 }
  0x49   : > { %160 = sbr.rel (%p5089_p0) target bundleno = 768 (0x300), region = 28 }
  0x50   : > { %s162_s21 = sand.u32 1, %s3168_s10   ;;  %p5090_p12 = scmp.ne.s32.totalorder %s5085_s17, 0 }
  0x51   : > { %s2400_s25 = sshll.u32 %s162_s21, 5  ;;  %s163_s26 = scalar_lea.sflag [#allocation4], %s162_s21 }
  0x52   : > { %s3336_s30 = scalar_lea.vmem [#allocation3], %s2400_s25 }
  0x53   : > { %3151 = dma.done.wait (%p5090_p12), %s163_s26, 512  }
  0x54   : > { %3153 = vsyncadd (%p5090_p12), %s163_s26, 4294966784  ;;  %p5091_p6 = scmp.ne.s32.totalorder %s5084_s16, 0 }
  0x56   : > { %3155 = dma.done.wait (%p5091_p6), [#allocation7], 2048  }
  0x57   : > { %3157 = vsyncadd (%p5091_p6), [#allocation7], 4294965248  ;;  %p2402_p7 = scmp.ne.s32.totalorder %s3176_s12, 0 }
  0x58   : > { %v3190_v0 = vmov (!%p2402_p7), 0.0  }
  0x59   : > { %191 = sbr.rel (%p2402_p7) target bundleno = 96 (0x60), region = 40  ;;  %192 = vst [vmem:[#allocation2] sm:$0xff] (!%p2402_p7), %v3190_v0 }
  0x60 PF: > { %v196_v1 = vlaneseq  ;;  %v5064_v2 = vmov 0.0   ;;  %v3352_v4 = vld [vmem:[%s3336_s30 + $0x8] sm:$0xff]  ;;  %v3192_v16 = vmov 1.0|1.0   ;;  %v3631_v37 = vld [vmem:[#allocation6] sm:$0xff]  ;;  %v3687_v39 = vld [vmem:[#allocation6 + $0x10] sm:$0xff] }
  0x61   : > { %1167 = vmatprep.mubr.f32.mxu0 %v5064_v2  ;;  %1328 = vmatprep.mubr.f32.mxu1 %v5064_v2  ;;  %v3655_v38 = vld [vmem:[#allocation6 + $0x8] sm:$0xff]  ;;  %v3722_v40 = vld [vmem:[#allocation6 + $0x18] sm:$0xff]  ;;  %v3757_v41 = vld [vmem:[#allocation6 + $0x20] sm:$0xff]  ;;  %p2795_p1 = scmp.ne.s32.totalorder %s3176_s12, 3 }
  0x62   : > { %v3349_v3 = vshrl.u32 %v196_v1, 7  ;;  %v3792_v42 = vld [vmem:[#allocation6 + $0x28] sm:$0xff]  ;;  %v3827_v43 = vld [vmem:[#allocation6 + $0x30] sm:$0xff]  ;;  %v3862_v44 = vld [vmem:[#allocation6 + $0x38] sm:$0xff] }
  0x63   : > { %v3889_v45 = vld [vmem:[#allocation6 + $0x40] sm:$0xff]  ;;  %v3897_v46 = vld [vmem:[#allocation6 + $0x48] sm:$0xff]  ;;  %v3903_v47 = vld [vmem:[#allocation6 + $0x50] sm:$0xff] }
  0x64   : > { %v3355_v5 = vsub.s32 1, %v3349_v3  ;;  %v3358_v6 = vadd.s32 8, %v3349_v3  ;;  %v3361_v7 = vsub.s32 3, %v3349_v3  ;;  %v3364_v8 = vsub.s32 0, %v3349_v3  ;;  %v3909_v48 = vld [vmem:[#allocation6 + $0x58] sm:$0xff]  ;;  %v3915_v49 = vld [vmem:[#allocation6 + $0x60] sm:$0xff] }
  0x65   : > { %v3367_v9 = vsub.s32 2, %v3349_v3  ;;  %v3370_v10 = vadd.s32 16, %v3349_v3  ;;  %v3385_v14 = vadd.s32 24, %v3349_v3  ;;  %v3413_v17 = vadd.s32 32, %v3349_v3  ;;  %v3921_v50 = vld [vmem:[#allocation6 + $0x68] sm:$0xff]  ;;  %v3927_v51 = vld [vmem:[#allocation6 + $0x70] sm:$0xff] }
  0x66   : > { %5092 = vst [vmem:[#allocation12_spill] sm:$0xff] %v3355_v5  ;;  %5093 = vst [vmem:[#allocation13_spill] sm:$0xff] %v3361_v7  ;;  %v3374_v11 = vrot.slane %v3352_v4, %v3355_v5  ;;  %v3378_v12 = vrot.slane %v3352_v4, %v3361_v7  ;;  %v3382_v13 = vrot.slane %v3352_v4, %v3364_v8  ;;  %v3416_v18 = vadd.s32 40, %v3349_v3  ;;  %v3933_v52 = vld [vmem:[#allocation6 + $0x78] sm:$0xff]  ;;  %v4003_v53 = vld [vmem:[%s3336_s30] sm:$0xff] }
  0x67   : > { %5094 = vst [vmem:[#allocation14_spill] sm:$0xff] %v3364_v8  ;;  %5095 = vst [vmem:[#allocation15_spill] sm:$0xff] %v3367_v9  ;;  %v3389_v15 = vrot.slane %v3352_v4, %v3367_v9  ;;  %v3439_v19 = vadd.s32 48, %v3349_v3  ;;  %v3442_v20 = vadd.s32 56, %v3349_v3  ;;  %v3465_v21 = vadd.s32 64, %v3349_v3 }
  0x68   : > { %5096 = vst [vmem:[#allocation16_spill] sm:$0xff] %v3385_v14  ;;  %vm704_vm0 = vcmp.eq.s32.totalorder %v3374_v11, %v3349_v3  ;;  %vm712_vm1 = vcmp.eq.s32.totalorder %v3374_v11, %v3358_v6  ;;  %vm706_vm2 = vcmp.eq.s32.totalorder %v3378_v12, %v3349_v3  ;;  %vm714_vm3 = vcmp.eq.s32.totalorder %v3378_v12, %v3358_v6 }
  0x69   : > { %vm2801_vm4 = vmpackc.low %vm712_vm1, %vm704_vm0  ;;  %vm703_vm5 = vcmp.eq.s32.totalorder %v3382_v13, %v3349_v3  ;;  %vm711_vm6 = vcmp.eq.s32.totalorder %v3382_v13, %v3358_v6  ;;  %vm705_vm7 = vcmp.eq.s32.totalorder %v3389_v15, %v3349_v3  ;;  %vm713_vm8 = vcmp.eq.s32.totalorder %v3389_v15, %v3358_v6  ;;  %5097 = vst [vmem:[#allocation17_spill] sm:$0xff] %v3413_v17 }
  0x6a   : > { %2802 = vmatprep.subr.msk.bf16.mxu0 %vm2801_vm4, %v3192_v16  ;;  %vm2833_vm9 = vmpackc.low %vm714_vm3, %vm706_vm2  ;;  %vm720_vm10 = vcmp.eq.s32.totalorder %v3374_v11, %v3370_v10  ;;  %vm728_vm11 = vcmp.eq.s32.totalorder %v3374_v11, %v3385_v14  ;;  %5098 = vst [vmem:[#allocation18_spill] sm:$0xff] %v3416_v18  ;;  %vm722_vm13 = vcmp.eq.s32.totalorder %v3378_v12, %v3370_v10  ;;  %v3468_v22 = vadd.s32 72, %v3349_v3 }
  0x6b   : > { %2834 = vmatprep.subr.msk.bf16.mxu1 %vm2833_vm9, %v3192_v16  ;;  %vm2803_vm12 = vmpackc.low %vm711_vm6, %vm703_vm5  ;;  %vm730_vm14 = vcmp.eq.s32.totalorder %v3378_v12, %v3385_v14  ;;  %vm719_vm0 = vcmp.eq.s32.totalorder %v3382_v13, %v3370_v10  ;;  %vm727_vm1 = vcmp.eq.s32.totalorder %v3382_v13, %v3385_v14  ;;  %vm721_vm3 = vcmp.eq.s32.totalorder %v3389_v15, %v3370_v10 }
  0x6c   : > { %2804 = vmatpush1.bf16.msk.msra.mxu0 %vm2803_vm12, %v3192_v16  ;;  %vm2835_vm15 = vmpackc.low %vm713_vm8, %vm705_vm7  ;;  %vm729_vm4 = vcmp.eq.s32.totalorder %v3389_v15, %v3385_v14  ;;  %vm736_vm6 = vcmp.eq.s32.totalorder %v3374_v11, %v3413_v17  ;;  %vm744_vm7 = vcmp.eq.s32.totalorder %v3374_v11, %v3416_v18  ;;  %5099 = vst [vmem:[#allocation19_spill] sm:$0xff] %v3439_v19  ;;  %v3491_v23 = vadd.s32 80, %v3349_v3 }
  0x6d   : > { %2836 = vmatpush1.bf16.msk.msra.mxu1 %vm2835_vm15, %v3192_v16  ;;  %vm2805_vm2 = vmpackc.low %vm728_vm11, %vm720_vm10  ;;  %5100 = vst [vmem:[#allocation20_spill] sm:$0xff] %v3442_v20  ;;  %vm738_vm9 = vcmp.eq.s32.totalorder %v3378_v12, %v3413_v17  ;;  %vm746_vm10 = vcmp.eq.s32.totalorder %v3378_v12, %v3416_v18  ;;  %vm735_vm12 = vcmp.eq.s32.totalorder %v3382_v13, %v3413_v17  ;;  %v3494_v24 = vadd.s32 88, %v3349_v3 }
  0x6e   : > { %2806 = vmatprep.subr.msk.bf16.mxu0 %vm2805_vm2, %v3192_v16  ;;  %vm2837_vm5 = vmpackc.low %vm730_vm14, %vm722_vm13  ;;  %vm743_vm13 = vcmp.eq.s32.totalorder %v3382_v13, %v3416_v18  ;;  %vm737_vm15 = vcmp.eq.s32.totalorder %v3389_v15, %v3413_v17  ;;  %vm752_vm2 = vcmp.eq.s32.totalorder %v3374_v11, %v3439_v19  ;;  %5101 = vst [vmem:[#allocation21_spill] sm:$0xff] %v3465_v21  ;;  %v3512_v25 = vadd.s32 96, %v3349_v3 }
  0x6f   : > { %2838 = vmatprep.subr.msk.bf16.mxu1 %vm2837_vm5, %v3192_v16  ;;  %vm2807_vm8 = vmpackc.low %vm727_vm1, %vm719_vm0  ;;  %vm745_vm0 = vcmp.eq.s32.totalorder %v3389_v15, %v3416_v18  ;;  %5102 = vst [vmem:[#allocation22_spill] sm:$0xff] %v3468_v22  ;;  %vm754_vm5 = vcmp.eq.s32.totalorder %v3378_v12, %v3439_v19  ;;  %v3520_v26 = vadd.s32 104, %v3349_v3  ;;  %v3543_v27 = vadd.s32 112, %v3349_v3 }
  0x70   : > { %2808 = vmatpush1.bf16.msk.msra.mxu0 %vm2807_vm8, %v3192_v16  ;;  %vm2839_vm11 = vmpackc.low %vm729_vm4, %vm721_vm3  ;;  %vm760_vm3 = vcmp.eq.s32.totalorder %v3374_v11, %v3442_v20  ;;  %vm751_vm8 = vcmp.eq.s32.totalorder %v3382_v13, %v3439_v19  ;;  %5103 = vst [vmem:[#allocation23_spill] sm:$0xff] %v3491_v23  ;;  %v3546_v28 = vadd.s32 120, %v3349_v3  ;;  %v3549_v29 = vsub.s32 5, %v3349_v3 }
  0x71   : > { %2840 = vmatpush1.bf16.msk.msra.mxu1 %vm2839_vm11, %v3192_v16  ;;  %vm2809_vm14 = vmpackc.low %vm744_vm7, %vm736_vm6  ;;  %vm762_vm6 = vcmp.eq.s32.totalorder %v3378_v12, %v3442_v20  ;;  %vm753_vm11 = vcmp.eq.s32.totalorder %v3389_v15, %v3439_v19  ;;  %5104 = vst [vmem:[#allocation24_spill] sm:$0xff] %v3494_v24  ;;  %v3557_v30 = vsub.s32 7, %v3349_v3  ;;  %v3568_v31 = vsub.s32 4, %v3349_v3 }
  0x72   : > { %2810 = vmatprep.subr.msk.bf16.mxu0 %vm2809_vm14, %v3192_v16  ;;  %vm2841_vm1 = vmpackc.low %vm746_vm10, %vm738_vm9  ;;  %vm759_vm9 = vcmp.eq.s32.totalorder %v3382_v13, %v3442_v20  ;;  %vm768_vm14 = vcmp.eq.s32.totalorder %v3374_v11, %v3465_v21  ;;  %5105 = vst [vmem:[#allocation25_spill] sm:$0xff] %v3512_v25  ;;  %v3582_v32 = vsub.s32 6, %v3349_v3  ;;  %v3591_v33 = vrot.slane %v3352_v4, %v3549_v29 }
  0x73   : > { %2842 = vmatprep.subr.msk.bf16.mxu1 %vm2841_vm1, %v3192_v16  ;;  %vm2811_vm4 = vmpackc.low %vm743_vm13, %vm735_vm12  ;;  %vm761_vm12 = vcmp.eq.s32.totalorder %v3389_v15, %v3442_v20  ;;  %vm770_vm1 = vcmp.eq.s32.totalorder %v3378_v12, %v3465_v21  ;;  %5106 = vst [vmem:[#allocation26_spill] sm:$0xff] %v3520_v26  ;;  %v3600_v34 = vrot.slane %v3352_v4, %v3557_v30 }
  0x74   : > { %2812 = vmatpush1.bf16.msk.msra.mxu0 %vm2811_vm4, %v3192_v16  ;;  %vm2843_vm7 = vmpackc.low %vm745_vm0, %vm737_vm15  ;;  %vm776_vm15 = vcmp.eq.s32.totalorder %v3374_v11, %v3468_v22  ;;  %vm767_vm4 = vcmp.eq.s32.totalorder %v3382_v13, %v3465_v21  ;;  %5107 = vst [vmem:[#allocation27_spill] sm:$0xff] %v3543_v27  ;;  %v3609_v35 = vrot.slane %v3352_v4, %v3568_v31 }
  0x75   : > { %2844 = vmatpush1.bf16.msk.msra.mxu1 %vm2843_vm7, %v3192_v16  ;;  %vm2813_vm10 = vmpackc.low %vm760_vm3, %vm752_vm2  ;;  %vm778_vm2 = vcmp.eq.s32.totalorder %v3378_v12, %v3468_v22  ;;  %vm769_vm7 = vcmp.eq.s32.totalorder %v3389_v15, %v3465_v21  ;;  %5108 = vst [vmem:[#allocation28_spill] sm:$0xff] %v3546_v28  ;;  %v3618_v36 = vrot.slane %v3352_v4, %v3582_v32 }
  0x76   : > { %2814 = vmatprep.subr.msk.bf16.mxu0 %vm2813_vm10, %v3192_v16  ;;  %vm2845_vm13 = vmpackc.low %vm762_vm6, %vm754_vm5  ;;  %vm775_vm5 = vcmp.eq.s32.totalorder %v3382_v13, %v3468_v22  ;;  %vm784_vm10 = vcmp.eq.s32.totalorder %v3374_v11, %v3491_v23  ;;  %5109 = vst [vmem:[#allocation29_spill] sm:$0xff] %v3557_v30  ;;  %v4007_v54 = vrot.slane %v4003_v53, %v3364_v8 }
  0x77   : > { %2846 = vmatprep.subr.msk.bf16.mxu1 %vm2845_vm13, %v3192_v16  ;;  %vm2815_vm0 = vmpackc.low %vm759_vm9, %vm751_vm8  ;;  %vm777_vm8 = vcmp.eq.s32.totalorder %v3389_v15, %v3468_v22  ;;  %vm786_vm13 = vcmp.eq.s32.totalorder %v3378_v12, %v3491_v23  ;;  %v4011_v55 = vrot.slane %v4003_v53, %v3367_v9  ;;  %v4015_v56 = vrot.slane %v4003_v53, %v3355_v5 }
  0x78   : > { %2816 = vmatpush1.bf16.msk.msra.mxu0 %vm2815_vm0, %v3192_v16  ;;  %vm2847_vm3 = vmpackc.low %vm761_vm12, %vm753_vm11  ;;  %vm792_vm11 = vcmp.eq.s32.totalorder %v3374_v11, %v3494_v24  ;;  %vm783_vm0 = vcmp.eq.s32.totalorder %v3382_v13, %v3491_v23  ;;  %v4019_v57 = vrot.slane %v4003_v53, %v3361_v7 }
  0x79   : > { %2848 = vmatpush1.bf16.msk.msra.mxu1 %vm2847_vm3, %v3192_v16  ;;  %vm2817_vm6 = vmpackc.low %vm776_vm15, %vm768_vm14  ;;  %vm794_vm14 = vcmp.eq.s32.totalorder %v3378_v12, %v3494_v24  ;;  %vm785_vm3 = vcmp.eq.s32.totalorder %v3389_v15, %v3491_v23 }
  0x7a   : > { %2818 = vmatprep.subr.msk.bf16.mxu0 %vm2817_vm6, %v3192_v16  ;;  %vm2849_vm9 = vmpackc.low %vm778_vm2, %vm770_vm1  ;;  %vm791_vm1 = vcmp.eq.s32.totalorder %v3382_v13, %v3494_v24 }
  0x7b   : > { %2850 = vmatprep.subr.msk.bf16.mxu1 %vm2849_vm9, %v3192_v16  ;;  %vm2819_vm12 = vmpackc.low %vm775_vm5, %vm767_vm4  ;;  %vm793_vm4 = vcmp.eq.s32.totalorder %v3389_v15, %v3494_v24  ;;  %vm800_vm5 = vcmp.eq.s32.totalorder %v3374_v11, %v3512_v25  ;;  %vm802_vm9 = vcmp.eq.s32.totalorder %v3378_v12, %v3512_v25 }
  0x7c   : > { %2820 = vmatpush1.bf16.msk.msra.mxu0 %vm2819_vm12, %v3192_v16  ;;  %vm2851_vm15 = vmpackc.low %vm777_vm8, %vm769_vm7  ;;  %vm808_vm7 = vcmp.eq.s32.totalorder %v3374_v11, %v3520_v26  ;;  %vm799_vm12 = vcmp.eq.s32.totalorder %v3382_v13, %v3512_v25 }
  0x7d   : > { %2852 = vmatpush1.bf16.msk.msra.mxu1 %vm2851_vm15, %v3192_v16  ;;  %vm2821_vm2 = vmpackc.low %vm792_vm11, %vm784_vm10  ;;  %vm810_vm10 = vcmp.eq.s32.totalorder %v3378_v12, %v3520_v26  ;;  %vm801_vm15 = vcmp.eq.s32.totalorder %v3389_v15, %v3512_v25 }
  0x7e   : > { %2822 = vmatprep.subr.msk.bf16.mxu0 %vm2821_vm2, %v3192_v16  ;;  %vm2853_vm6 = vmpackc.low %vm794_vm14, %vm786_vm13  ;;  %vm807_vm13 = vcmp.eq.s32.totalorder %v3382_v13, %v3520_v26  ;;  %vm816_vm2 = vcmp.eq.s32.totalorder %v3374_v11, %v3543_v27 }
  0x7f   : > { %2854 = vmatprep.subr.msk.bf16.mxu1 %vm2853_vm6, %v3192_v16  ;;  %vm2823_vm8 = vmpackc.low %vm791_vm1, %vm783_vm0  ;;  %vm809_vm0 = vcmp.eq.s32.totalorder %v3389_v15, %v3520_v26  ;;  %vm826_vm6 = vcmp.eq.s32.totalorder %v3378_v12, %v3546_v28 }
  0x80   : > { %2824 = vmatpush1.bf16.msk.msra.mxu0 %vm2823_vm8, %v3192_v16  ;;  %vm2855_vm11 = vmpackc.low %vm793_vm4, %vm785_vm3  ;;  %vm824_vm3 = vcmp.eq.s32.totalorder %v3374_v11, %v3546_v28  ;;  %vm815_vm8 = vcmp.eq.s32.totalorder %v3382_v13, %v3543_v27 }
  0x81   : > { %2856 = vmatpush1.bf16.msk.msra.mxu1 %vm2855_vm11, %v3192_v16  ;;  %vm2825_vm14 = vmpackc.low %vm808_vm7, %vm800_vm5  ;;  %vm818_vm5 = vcmp.eq.s32.totalorder %v3378_v12, %v3543_v27  ;;  %vm817_vm11 = vcmp.eq.s32.totalorder %v3389_v15, %v3543_v27 }
  0x82   : > { %2826 = vmatprep.subr.msk.bf16.mxu0 %vm2825_vm14, %v3192_v16  ;;  %vm2857_vm1 = vmpackc.low %vm810_vm10, %vm802_vm9  ;;  %vm823_vm9 = vcmp.eq.s32.totalorder %v3382_v13, %v3546_v28  ;;  %vm708_vm14 = vcmp.eq.s32.totalorder %v3591_v33, %v3349_v3 }
  0x83   : > { %2858 = vmatprep.subr.msk.bf16.mxu1 %vm2857_vm1, %v3192_v16  ;;  %vm2827_vm4 = vmpackc.low %vm807_vm13, %vm799_vm12  ;;  %vm825_vm12 = vcmp.eq.s32.totalorder %v3389_v15, %v3546_v28  ;;  %vm710_vm1 = vcmp.eq.s32.totalorder %v3600_v34, %v3349_v3 }
  0x84   : > { %2828 = vmatpush1.bf16.msk.msra.mxu0 %vm2827_vm4, %v3192_v16  ;;  %vm2859_vm7 = vmpackc.low %vm809_vm0, %vm801_vm15  ;;  %vm716_vm15 = vcmp.eq.s32.totalorder %v3591_v33, %v3358_v6  ;;  %vm707_vm4 = vcmp.eq.s32.totalorder %v3609_v35, %v3349_v3 }
  0x85   : > { %2860 = vmatpush1.bf16.msk.msra.mxu1 %vm2859_vm7, %v3192_v16  ;;  %vm2829_vm10 = vmpackc.low %vm824_vm3, %vm816_vm2  ;;  %vm718_vm2 = vcmp.eq.s32.totalorder %v3600_v34, %v3358_v6  ;;  %vm709_vm7 = vcmp.eq.s32.totalorder %v3618_v36, %v3349_v3 }
  0x86   : > { %2830 = vmatprep.subr.msk.bf16.mxu0 %vm2829_vm10, %v3192_v16  ;;  %vm2861_vm13 = vmpackc.low %vm826_vm6, %vm818_vm5  ;;  %vm715_vm5 = vcmp.eq.s32.totalorder %v3609_v35, %v3358_v6  ;;  %vm724_vm10 = vcmp.eq.s32.totalorder %v3591_v33, %v3370_v10 }
  0x87   : > { %2862 = vmatprep.subr.msk.bf16.mxu1 %vm2861_vm13, %v3192_v16  ;;  %vm2831_vm0 = vmpackc.low %vm823_vm9, %vm815_vm8  ;;  %vm717_vm8 = vcmp.eq.s32.totalorder %v3618_v36, %v3358_v6  ;;  %vm726_vm13 = vcmp.eq.s32.totalorder %v3600_v34, %v3370_v10 }
  0x88   : > { %2832 = vmatpush1.bf16.msk.msra.mxu0 %vm2831_vm0, %v3192_v16  ;;  %vm2863_vm3 = vmpackc.low %vm825_vm12, %vm817_vm11  ;;  %vm732_vm11 = vcmp.eq.s32.totalorder %v3591_v33, %v3385_v14  ;;  %vm723_vm0 = vcmp.eq.s32.totalorder %v3609_v35, %v3370_v10 }
  0x89   : > { %2864 = vmatpush1.bf16.msk.msra.mxu1 %vm2863_vm3, %v3192_v16  ;;  %vm2865_vm6 = vmpackc.low %vm716_vm15, %vm708_vm14  ;;  %vm734_vm14 = vcmp.eq.s32.totalorder %v3600_v34, %v3385_v14  ;;  %vm725_vm3 = vcmp.eq.s32.totalorder %v3618_v36, %v3370_v10 }
  0x8a   : > { %2866 = vmatprep.subr.msk.bf16.mxu0 %vm2865_vm6, %v3192_v16  ;;  %vm2897_vm9 = vmpackc.low %vm718_vm2, %vm710_vm1  ;;  %vm731_vm1 = vcmp.eq.s32.totalorder %v3609_v35, %v3385_v14  ;;  %vm740_vm6 = vcmp.eq.s32.totalorder %v3591_v33, %v3413_v17 }
  0x8b   : > { %1168 = vmatmul.mubr.f32.vlgmr.msra.gmra.mrb[0].mxu0 %v3631_v37  ;;  %2898 = vmatprep.subr.msk.bf16.mxu1 %vm2897_vm9, %v3192_v16  ;;  %vm2867_vm12 = vmpackc.low %vm715_vm5, %vm707_vm4  ;;  %vm733_vm4 = vcmp.eq.s32.totalorder %v3618_v36, %v3385_v14  ;;  %vm742_vm9 = vcmp.eq.s32.totalorder %v3600_v34, %v3413_v17 }
  0x8c   : > { %1329 = vmatmul.mubr.f32.vlgmr.msra.gmra.mrb[0].mxu1 %v3631_v37  ;;  %2868 = vmatpush1.bf16.msk.msra.mxu0 %vm2867_vm12, %v3192_v16  ;;  %vm2899_vm15 = vmpackc.low %vm717_vm8, %vm709_vm7  ;;  %vm748_vm7 = vcmp.eq.s32.totalorder %v3591_v33, %v3416_v18  ;;  %vm739_vm12 = vcmp.eq.s32.totalorder %v3609_v35, %v3413_v17 }
  0x8d   : > { %2900 = vmatpush1.bf16.msk.msra.mxu1 %vm2899_vm15, %v3192_v16  ;;  %1173 = vmatprep.mubr.f32.mxu0 %v5064_v2  ;;  %vm2869_vm2 = vmpackc.low %vm732_vm11, %vm724_vm10  ;;  %vm750_vm10 = vcmp.eq.s32.totalorder %v3600_v34, %v3416_v18  ;;  %vm741_vm15 = vcmp.eq.s32.totalorder %v3618_v36, %v3413_v17 }
  0x8e   : > { %1334 = vmatprep.mubr.f32.mxu1 %v5064_v2  ;;  %2870 = vmatprep.subr.msk.bf16.mxu0 %vm2869_vm2, %v3192_v16  ;;  %vm2901_vm5 = vmpackc.low %vm734_vm14, %vm726_vm13  ;;  %vm747_vm13 = vcmp.eq.s32.totalorder %v3609_v35, %v3416_v18  ;;  %vm756_vm2 = vcmp.eq.s32.totalorder %v3591_v33, %v3439_v19 }
  0x8f   : > { %1174 = vmatmul.mubr.f32.gmra.mrb[2].mxu0 %v3655_v38  ;;  %2902 = vmatprep.subr.msk.bf16.mxu1 %vm2901_vm5, %v3192_v16  ;;  %vm2871_vm8 = vmpackc.low %vm731_vm1, %vm723_vm0  ;;  %vm749_vm0 = vcmp.eq.s32.totalorder %v3618_v36, %v3416_v18  ;;  %vm758_vm5 = vcmp.eq.s32.totalorder %v3600_v34, %v3439_v19 }
  0x90   : > { %1335 = vmatmul.mubr.f32.gmra.mrb[2].mxu1 %v3655_v38  ;;  %1179 = vmatprep.mubr.f32.mxu0 %v5064_v2  ;;  %vm2903_vm11 = vmpackc.low %vm733_vm4, %vm725_vm3  ;;  %vm764_vm3 = vcmp.eq.s32.totalorder %v3591_v33, %v3442_v20 }
  0x91   : > { %1340 = vmatprep.mubr.f32.mxu1 %v5064_v2  ;;  %2872 = vmatpush1.bf16.msk.msra.mxu0 %vm2871_vm8, %v3192_v16  ;;  %vm2873_vm14 = vmpackc.low %vm748_vm7, %vm740_vm6  ;;  %vm766_vm6 = vcmp.eq.s32.totalorder %v3600_v34, %v3442_v20  ;;  %vm755_vm8 = vcmp.eq.s32.totalorder %v3609_v35, %v3439_v19 }
  0x92   : > { %2904 = vmatpush1.bf16.msk.msra.mxu1 %vm2903_vm11, %v3192_v16  ;;  %2874 = vmatprep.subr.msk.bf16.mxu0 %vm2873_vm14, %v3192_v16  ;;  %vm2905_vm1 = vmpackc.low %vm750_vm10, %vm742_vm9  ;;  %vm763_vm9 = vcmp.eq.s32.totalorder %v3609_v35, %v3442_v20  ;;  %vm757_vm11 = vcmp.eq.s32.totalorder %v3618_v36, %v3439_v19  ;;  %vm772_vm14 = vcmp.eq.s32.totalorder %v3591_v33, %v3465_v21 }
  0x93   : > { %1180 = vmatmul.mubr.f32.gmra.mrb[4].mxu0 %v3687_v39  ;;  %2906 = vmatprep.subr.msk.bf16.mxu1 %vm2905_vm1, %v3192_v16  ;;  %vm2875_vm4 = vmpackc.low %vm747_vm13, %vm739_vm12  ;;  %vm765_vm12 = vcmp.eq.s32.totalorder %v3618_v36, %v3442_v20  ;;  %vm774_vm1 = vcmp.eq.s32.totalorder %v3600_v34, %v3465_v21 }
  0x94   : > { %1341 = vmatmul.mubr.f32.gmra.mrb[4].mxu1 %v3687_v39  ;;  %1185 = vmatprep.mubr.f32.mxu0 %v5064_v2  ;;  %vm2907_vm7 = vmpackc.low %vm749_vm0, %vm741_vm15  ;;  %vm780_vm15 = vcmp.eq.s32.totalorder %v3591_v33, %v3468_v22 }
  0x95   : > { %1346 = vmatprep.mubr.f32.mxu1 %v5064_v2  ;;  %2876 = vmatpush1.bf16.msk.msra.mxu0 %vm2875_vm4, %v3192_v16  ;;  %vm2877_vm10 = vmpackc.low %vm764_vm3, %vm756_vm2  ;;  %vm782_vm2 = vcmp.eq.s32.totalorder %v3600_v34, %v3468_v22  ;;  %vm771_vm4 = vcmp.eq.s32.totalorder %v3609_v35, %v3465_v21 }
  0x96   : > { %2908 = vmatpush1.bf16.msk.msra.mxu1 %vm2907_vm7, %v3192_v16  ;;  %2878 = vmatprep.subr.msk.bf16.mxu0 %vm2877_vm10, %v3192_v16  ;;  %vm2909_vm13 = vmpackc.low %vm766_vm6, %vm758_vm5  ;;  %vm779_vm5 = vcmp.eq.s32.totalorder %v3609_v35, %v3468_v22  ;;  %vm773_vm7 = vcmp.eq.s32.totalorder %v3618_v36, %v3465_v21  ;;  %vm788_vm10 = vcmp.eq.s32.totalorder %v3591_v33, %v3491_v23 }
  0x97   : > { %1186 = vmatmul.mubr.f32.gmra.mrb[6].mxu0 %v3722_v40  ;;  %2910 = vmatprep.subr.msk.bf16.mxu1 %vm2909_vm13, %v3192_v16  ;;  %vm2879_vm0 = vmpackc.low %vm763_vm9, %vm755_vm8  ;;  %vm781_vm8 = vcmp.eq.s32.totalorder %v3618_v36, %v3468_v22  ;;  %vm790_vm13 = vcmp.eq.s32.totalorder %v3600_v34, %v3491_v23 }
  0x98   : > { %1347 = vmatmul.mubr.f32.gmra.mrb[6].mxu1 %v3722_v40  ;;  %1191 = vmatprep.mubr.f32.mxu0 %v5064_v2  ;;  %vm2911_vm3 = vmpackc.low %vm765_vm12, %vm757_vm11  ;;  %vm796_vm11 = vcmp.eq.s32.totalorder %v3591_v33, %v3494_v24 }
  0x99   : > { %1352 = vmatprep.mubr.f32.mxu1 %v5064_v2  ;;  %2880 = vmatpush1.bf16.msk.msra.mxu0 %vm2879_vm0, %v3192_v16  ;;  %vm2881_vm6 = vmpackc.low %vm780_vm15, %vm772_vm14  ;;  %vm798_vm14 = vcmp.eq.s32.totalorder %v3600_v34, %v3494_v24  ;;  %vm787_vm0 = vcmp.eq.s32.totalorder %v3609_v35, %v3491_v23 }
  0x9a   : > { %2912 = vmatpush1.bf16.msk.msra.mxu1 %vm2911_vm3, %v3192_v16  ;;  %2882 = vmatprep.subr.msk.bf16.mxu0 %vm2881_vm6, %v3192_v16  ;;  %vm2913_vm9 = vmpackc.low %vm782_vm2, %vm774_vm1  ;;  %vm795_vm1 = vcmp.eq.s32.totalorder %v3609_v35, %v3494_v24  ;;  %vm789_vm3 = vcmp.eq.s32.totalorder %v3618_v36, %v3491_v23  ;;  %vm804_vm6 = vcmp.eq.s32.totalorder %v3591_v33, %v3512_v25 }
  0x9b   : > { %1192 = vmatmul.mubr.f32.gmra.mrb[8].mxu0 %v3757_v41  ;;  %2914 = vmatprep.subr.msk.bf16.mxu1 %vm2913_vm9, %v3192_v16  ;;  %vm2883_vm12 = vmpackc.low %vm779_vm5, %vm771_vm4  ;;  %vm797_vm4 = vcmp.eq.s32.totalorder %v3618_v36, %v3494_v24  ;;  %vm806_vm9 = vcmp.eq.s32.totalorder %v3600_v34, %v3512_v25 }
  0x9c   : > { %1353 = vmatmul.mubr.f32.gmra.mrb[8].mxu1 %v3757_v41  ;;  %1197 = vmatprep.mubr.f32.mxu0 %v5064_v2  ;;  %vm2915_vm15 = vmpackc.low %vm781_vm8, %vm773_vm7  ;;  %vm812_vm7 = vcmp.eq.s32.totalorder %v3591_v33, %v3520_v26 }
  0x9d   : > { %1358 = vmatprep.mubr.f32.mxu1 %v5064_v2  ;;  %2884 = vmatpush1.bf16.msk.msra.mxu0 %vm2883_vm12, %v3192_v16  ;;  %vm2885_vm2 = vmpackc.low %vm796_vm11, %vm788_vm10  ;;  %vm814_vm10 = vcmp.eq.s32.totalorder %v3600_v34, %v3520_v26  ;;  %vm803_vm12 = vcmp.eq.s32.totalorder %v3609_v35, %v3512_v25 }
  0x9e   : > { %2916 = vmatpush1.bf16.msk.msra.mxu1 %vm2915_vm15, %v3192_v16  ;;  %2886 = vmatprep.subr.msk.bf16.mxu0 %vm2885_vm2, %v3192_v16  ;;  %vm2917_vm5 = vmpackc.low %vm798_vm14, %vm790_vm13  ;;  %vm811_vm13 = vcmp.eq.s32.totalorder %v3609_v35, %v3520_v26  ;;  %vm805_vm15 = vcmp.eq.s32.totalorder %v3618_v36, %v3512_v25  ;;  %vm820_vm2 = vcmp.eq.s32.totalorder %v3591_v33, %v3543_v27 }
  0x9f   : > { %1198 = vmatmul.mubr.f32.gmra.mrb[10].mxu0 %v3792_v42  ;;  %2918 = vmatprep.subr.msk.bf16.mxu1 %vm2917_vm5, %v3192_v16  ;;  %vm2887_vm8 = vmpackc.low %vm795_vm1, %vm787_vm0  ;;  %vm813_vm0 = vcmp.eq.s32.totalorder %v3618_v36, %v3520_v26  ;;  %vm822_vm5 = vcmp.eq.s32.totalorder %v3600_v34, %v3543_v27 }
  0xa0   : > { %1359 = vmatmul.mubr.f32.gmra.mrb[10].mxu1 %v3792_v42  ;;  %1203 = vmatprep.mubr.f32.mxu0 %v5064_v2  ;;  %vm2919_vm11 = vmpackc.low %vm797_vm4, %vm789_vm3  ;;  %vm828_vm3 = vcmp.eq.s32.totalorder %v3591_v33, %v3546_v28 }
  0xa1   : > { %1364 = vmatprep.mubr.f32.mxu1 %v5064_v2  ;;  %2888 = vmatpush1.bf16.msk.msra.mxu0 %vm2887_vm8, %v3192_v16  ;;  %vm2889_vm14 = vmpackc.low %vm812_vm7, %vm804_vm6  ;;  %vm830_vm6 = vcmp.eq.s32.totalorder %v3600_v34, %v3546_v28  ;;  %vm819_vm8 = vcmp.eq.s32.totalorder %v3609_v35, %v3543_v27 }
  0xa2   : > { %2920 = vmatpush1.bf16.msk.msra.mxu1 %vm2919_vm11, %v3192_v16  ;;  %2890 = vmatprep.subr.msk.bf16.mxu0 %vm2889_vm14, %v3192_v16  ;;  %vm2921_vm1 = vmpackc.low %vm814_vm10, %vm806_vm9  ;;  %vm827_vm9 = vcmp.eq.s32.totalorder %v3609_v35, %v3546_v28  ;;  %vm821_vm11 = vcmp.eq.s32.totalorder %v3618_v36, %v3543_v27 }
  0xa3   : > { %1204 = vmatmul.mubr.f32.gmra.mrb[12].mxu0 %v3827_v43  ;;  %2922 = vmatprep.subr.msk.bf16.mxu1 %vm2921_vm1, %v3192_v16  ;;  %vm2891_vm4 = vmpackc.low %vm811_vm13, %vm803_vm12  ;;  %vm829_vm12 = vcmp.eq.s32.totalorder %v3618_v36, %v3546_v28  ;;  %vm289_vm1 = vcmp.eq.s32.totalorder %v4011_v55, %v3349_v3 }
  0xa4   : > { %1365 = vmatmul.mubr.f32.gmra.mrb[12].mxu1 %v3827_v43  ;;  %1209 = vmatprep.mubr.f32.mxu0 %v5064_v2  ;;  %vm2923_vm7 = vmpackc.low %vm813_vm0, %vm805_vm15  ;;  %vm287_vm0 = vcmp.eq.s32.totalorder %v4007_v54, %v3349_v3  ;;  %v4045_v59 = vsel %vm289_vm1, 1.0, %v5064_v2  ;;  %vm321_vm1 = vcmp.eq.s32.totalorder %v4011_v55, %v3413_v17 }
  0xa5   : > { %1370 = vmatprep.mubr.f32.mxu1 %v5064_v2  ;;  %2892 = vmatpush1.bf16.msk.msra.mxu0 %vm2891_vm4, %v3192_v16  ;;  %vm2893_vm10 = vmpackc.low %vm828_vm3, %vm820_vm2  ;;  %vm288_vm2 = vcmp.eq.s32.totalorder %v4015_v56, %v3349_v3  ;;  %vm290_vm3 = vcmp.eq.s32.totalorder %v4019_v57, %v3349_v3  ;;  %vm295_vm4 = vcmp.eq.s32.totalorder %v4007_v54, %v3358_v6  ;;  %v4042_v58 = vsel %vm287_vm0, 1.0, %v5064_v2 }
  0xa6   : > { %2924 = vmatpush1.bf16.msk.msra.mxu1 %vm2923_vm7, %v3192_v16  ;;  %2894 = vmatprep.subr.msk.bf16.mxu0 %vm2893_vm10, %v3192_v16  ;;  %vm2925_vm13 = vmpackc.low %vm830_vm6, %vm822_vm5  ;;  %vm297_vm5 = vcmp.eq.s32.totalorder %v4011_v55, %v3358_v6  ;;  %vm296_vm6 = vcmp.eq.s32.totalorder %v4015_v56, %v3358_v6  ;;  %vm298_vm7 = vcmp.eq.s32.totalorder %v4019_v57, %v3358_v6  ;;  %v4048_v60 = vsel %vm288_vm2, 1.0, %v5064_v2 }
  0xa7   : > { %1210 = vmatmul.mubr.f32.gmra.mrb[14].mxu0 %v3862_v44  ;;  %2926 = vmatprep.subr.msk.bf16.mxu1 %vm2925_vm13, %v3192_v16  ;;  %vm2895_vm14 = vmpackc.low %vm827_vm9, %vm819_vm8  ;;  %vm303_vm8 = vcmp.eq.s32.totalorder %v4007_v54, %v3370_v10  ;;  %vm305_vm9 = vcmp.eq.s32.totalorder %v4011_v55, %v3370_v10  ;;  %v4051_v61 = vsel %vm290_vm3, 1.0, %v5064_v2  ;;  %v4054_v62 = vsel %vm295_vm4, 1.0, %v5064_v2 }
  0xa8   : > { %1371 = vmatmul.mubr.f32.gmra.mrb[14].mxu1 %v3862_v44  ;;  %1215 = vmatprep.mubr.f32.mxu0 %v5064_v2  ;;  %vm2927_vm15 = vmpackc.low %vm829_vm12, %vm821_vm11  ;;  %v4057_v63 = vsel %vm297_vm5, 1.0, %v5064_v2  ;;  %v4060_v0 = vsel %vm296_vm6, 1.0, %v5064_v2  ;;  %v4063_v1 = vsel %vm298_vm7, 1.0, %v5064_v2  ;;  %v4066_v4 = vsel %vm303_vm8, 1.0, %v5064_v2 }
  0xa9   : > { %1376 = vmatprep.mubr.f32.mxu1 %v5064_v2  ;;  %2896 = vmatpush1.bf16.msk.msra.mxu0 %vm2895_vm14, %v3192_v16  ;;  %v4069_v11 = vsel %vm305_vm9, 1.0, %v5064_v2  ;;  %vm304_vm10 = vcmp.eq.s32.totalorder %v4015_v56, %v3370_v10  ;;  %vm306_vm11 = vcmp.eq.s32.totalorder %v4019_v57, %v3370_v10  ;;  %vm311_vm12 = vcmp.eq.s32.totalorder %v4007_v54, %v3385_v14 }
  0xaa   : > { %2928 = vmatpush1.bf16.msk.msra.mxu1 %vm2927_vm15, %v3192_v16  ;;  %vm313_vm13 = vcmp.eq.s32.totalorder %v4011_v55, %v3385_v14  ;;  %vm312_vm14 = vcmp.eq.s32.totalorder %v4015_v56, %v3385_v14  ;;  %vm314_vm15 = vcmp.eq.s32.totalorder %v4019_v57, %v3385_v14  ;;  %vm319_vm0 = vcmp.eq.s32.totalorder %v4007_v54, %v3413_v17 }
  0xab   : > { %1216 = vmatmul.mubr.f32.gmra.mrb[16].mxu0 %v3889_v45  ;;  %vm320_vm2 = vcmp.eq.s32.totalorder %v4015_v56, %v3413_v17  ;;  %v4090_v12 = vsel %vm304_vm10, 1.0, %v5064_v2  ;;  %vm322_vm3 = vcmp.eq.s32.totalorder %v4019_v57, %v3413_v17  ;;  %vm327_vm4 = vcmp.eq.s32.totalorder %v4007_v54, %v3416_v18 }
  0xac   : > { %1377 = vmatmul.mubr.f32.gmra.mrb[16].mxu1 %v3889_v45  ;;  %1221 = vmatprep.mubr.f32.mxu0 %v5064_v2  ;;  %vm329_vm5 = vcmp.eq.s32.totalorder %v4011_v55, %v3416_v18  ;;  %v4099_v13 = vsel %vm306_vm11, 1.0, %v5064_v2  ;;  %v4102_v15 = vsel %vm311_vm12, 1.0, %v5064_v2  ;;  %v4105_v16 = vsel %vm313_vm13, 1.0, %v5064_v2 }
  0xad   : > { %1382 = vmatprep.mubr.f32.mxu1 %v5064_v2  ;;  %v4108_v33 = vsel %vm312_vm14, 1.0, %v5064_v2  ;;  %v4111_v34 = vsel %vm314_vm15, 1.0, %v5064_v2  ;;  %v4114_v35 = vsel %vm319_vm0, 1.0, %v5064_v2  ;;  %v4117_v36 = vsel %vm321_vm1, 1.0, %v5064_v2 }
  0xae   : > { %vm328_vm6 = vcmp.eq.s32.totalorder %v4015_v56, %v3416_v18  ;;  %vm330_vm7 = vcmp.eq.s32.totalorder %v4019_v57, %v3416_v18  ;;  %vm335_vm8 = vcmp.eq.s32.totalorder %v4007_v54, %v3439_v19  ;;  %vm337_vm9 = vcmp.eq.s32.totalorder %v4011_v55, %v3439_v19 }
  0xaf   : > { %1222 = vmatmul.mubr.f32.gmra.mrb[18].mxu0 %v3897_v46  ;;  %vm336_vm10 = vcmp.eq.s32.totalorder %v4015_v56, %v3439_v19  ;;  %vm338_vm11 = vcmp.eq.s32.totalorder %v4019_v57, %v3439_v19  ;;  %vm343_vm12 = vcmp.eq.s32.totalorder %v4007_v54, %v3442_v20  ;;  %vm345_vm13 = vcmp.eq.s32.totalorder %v4011_v55, %v3442_v20 }
  0xb0   : > { %1383 = vmatmul.mubr.f32.gmra.mrb[18].mxu1 %v3897_v46  ;;  %1227 = vmatprep.mubr.f32.mxu0 %v5064_v2  ;;  %vm344_vm14 = vcmp.eq.s32.totalorder %v4015_v56, %v3442_v20  ;;  %vm346_vm15 = vcmp.eq.s32.totalorder %v4019_v57, %v3442_v20  ;;  %vm351_vm0 = vcmp.eq.s32.totalorder %v4007_v54, %v3465_v21 }
  0xb1   : > { %1388 = vmatprep.mubr.f32.mxu1 %v5064_v2  ;;  %vm353_vm1 = vcmp.eq.s32.totalorder %v4011_v55, %v3465_v21 }
  0xb3   : > { %1228 = vmatmul.mubr.f32.gmra.mrb[20].mxu0 %v3903_v47 }
  0xb4   : > { %1389 = vmatmul.mubr.f32.gmra.mrb[20].mxu1 %v3903_v47  ;;  %1233 = vmatprep.mubr.f32.mxu0 %v5064_v2 }
  0xb5   : > { %1394 = vmatprep.mubr.f32.mxu1 %v5064_v2 }
  0xb7   : > { %1234 = vmatmul.mubr.f32.gmra.mrb[22].mxu0 %v3909_v48 }
  0xb8   : > { %1395 = vmatmul.mubr.f32.gmra.mrb[22].mxu1 %v3909_v48  ;;  %1239 = vmatprep.mubr.f32.mxu0 %v5064_v2 }
  0xb9   : > { %1400 = vmatprep.mubr.f32.mxu1 %v5064_v2 }
  0xbb   : > { %1240 = vmatmul.mubr.f32.gmra.mrb[24].mxu0 %v3915_v49 }
  0xbc   : > { %1401 = vmatmul.mubr.f32.gmra.mrb[24].mxu1 %v3915_v49  ;;  %1245 = vmatprep.mubr.f32.mxu0 %v5064_v2 }
  0xbd   : > { %1406 = vmatprep.mubr.f32.mxu1 %v5064_v2 }
  0xbf   : > { %1246 = vmatmul.mubr.f32.gmra.mrb[26].mxu0 %v3921_v50 }
  0xc0   : > { %1407 = vmatmul.mubr.f32.gmra.mrb[26].mxu1 %v3921_v50  ;;  %1251 = vmatprep.mubr.f32.mxu0 %v5064_v2 }
  0xc1   : > { %1412 = vmatprep.mubr.f32.mxu1 %v5064_v2 }
  0xc3   : > { %1252 = vmatmul.mubr.f32.gmra.mrb[28].mxu0 %v3927_v51 }
  0xc4   : > { %1413 = vmatmul.mubr.f32.gmra.mrb[28].mxu1 %v3927_v51  ;;  %1257 = vmatprep.mubr.f32.mxu0 %v5064_v2 }
  0xc5   : > { %1418 = vmatprep.mubr.f32.mxu1 %v5064_v2 }
  0xc7   : > { %1258 = vmatmul.mubr.f32.gmra.mrb[30].mxu0 %v3933_v52 }
  0xc8   : > { %1419 = vmatmul.mubr.f32.gmra.mrb[30].mxu1 %v3933_v52  ;;  %1489 = vmatprep.mubr.f32.mxu0 %v5064_v2 }
  0xc9   : > { %1650 = vmatprep.mubr.f32.mxu1 %v5064_v2 }
  0xcb   : > { %1490 = vmatmul.mubr.f32.vlgmr.msra.gmra.mrb[32].mxu0 %v3631_v37 }
  0xcc   : > { %1651 = vmatmul.mubr.f32.vlgmr.msra.gmra.mrb[32].mxu1 %v3631_v37  ;;  %1495 = vmatprep.mubr.f32.mxu0 %v5064_v2  ;;  %v4120_v37 = vsel %vm320_vm2, 1.0, %v5064_v2  ;;  %vm352_vm2 = vcmp.eq.s32.totalorder %v4015_v56, %v3465_v21 }
  0xcd   : > { %1656 = vmatprep.mubr.f32.mxu1 %v5064_v2 }
  0xcf   : > { %1496 = vmatmul.mubr.f32.gmra.mrb[34].mxu0 %v3655_v38 }
  0xd0   : > { %1657 = vmatmul.mubr.f32.gmra.mrb[34].mxu1 %v3655_v38  ;;  %1501 = vmatprep.mubr.f32.mxu0 %v5064_v2  ;;  %v4123_v38 = vsel %vm322_vm3, 1.0, %v5064_v2  ;;  %vm354_vm3 = vcmp.eq.s32.totalorder %v4019_v57, %v3465_v21  ;;  %v4210_v21 = vsel %vm352_vm2, 1.0, %v5064_v2  ;;  %vm384_vm2 = vcmp.eq.s32.totalorder %v4015_v56, %v3512_v25 }
  0xd1   : > { %1662 = vmatprep.mubr.f32.mxu1 %v5064_v2  ;;  %5115 = vst [vmem:[#allocation35_spill] sm:$0xff] %v4210_v21 }
  0xd3   : > { %1502 = vmatmul.mubr.f32.gmra.mrb[36].mxu0 %v3687_v39 }
  0xd4   : > { %1663 = vmatmul.mubr.f32.gmra.mrb[36].mxu1 %v3687_v39  ;;  %1507 = vmatprep.mubr.f32.mxu0 %v5064_v2  ;;  %v4126_v39 = vsel %vm327_vm4, 1.0, %v5064_v2  ;;  %vm359_vm4 = vcmp.eq.s32.totalorder %v4007_v54, %v3468_v22 }
  0xd5   : > { %1668 = vmatprep.mubr.f32.mxu1 %v5064_v2  ;;  %v4222_v20 = vsel %vm359_vm4, 1.0, %v5064_v2  ;;  %vm391_vm4 = vcmp.eq.s32.totalorder %v4007_v54, %v3520_v26 }
  0xd6   : > { %5117 = vst [vmem:[#allocation37_spill] sm:$0xff] %v4222_v20 }
  0xd7   : > { %1508 = vmatmul.mubr.f32.gmra.mrb[38].mxu0 %v3722_v40 }
  0xd8   : > { %1669 = vmatmul.mubr.f32.gmra.mrb[38].mxu1 %v3722_v40  ;;  %1513 = vmatprep.mubr.f32.mxu0 %v5064_v2  ;;  %v4129_v40 = vsel %vm329_vm5, 1.0, %v5064_v2  ;;  %vm361_vm5 = vcmp.eq.s32.totalorder %v4011_v55, %v3468_v22 }
  0xd9   : > { %1674 = vmatprep.mubr.f32.mxu1 %v5064_v2  ;;  %v4225_v19 = vsel %vm361_vm5, 1.0, %v5064_v2  ;;  %vm393_vm5 = vcmp.eq.s32.totalorder %v4011_v55, %v3520_v26 }
  0xda   : > { %5118 = vst [vmem:[#allocation38_spill] sm:$0xff] %v4225_v19 }
  0xdb   : > { %1514 = vmatmul.mubr.f32.gmra.mrb[40].mxu0 %v3757_v41 }
  0xdc   : > { %1675 = vmatmul.mubr.f32.gmra.mrb[40].mxu1 %v3757_v41  ;;  %1519 = vmatprep.mubr.f32.mxu0 %v5064_v2  ;;  %v4150_v41 = vsel %vm328_vm6, 1.0, %v5064_v2  ;;  %vm360_vm6 = vcmp.eq.s32.totalorder %v4015_v56, %v3468_v22 }
  0xdd   : > { %1680 = vmatprep.mubr.f32.mxu1 %v5064_v2  ;;  %v4228_v18 = vsel %vm360_vm6, 1.0, %v5064_v2  ;;  %vm392_vm6 = vcmp.eq.s32.totalorder %v4015_v56, %v3520_v26 }
  0xde   : > { %5119 = vst [vmem:[#allocation39_spill] sm:$0xff] %v4228_v18 }
  0xdf   : > { %1520 = vmatmul.mubr.f32.gmra.mrb[42].mxu0 %v3792_v42 }
  0xe0   : > { %1681 = vmatmul.mubr.f32.gmra.mrb[42].mxu1 %v3792_v42  ;;  %1525 = vmatprep.mubr.f32.mxu0 %v5064_v2  ;;  %v4159_v42 = vsel %vm330_vm7, 1.0, %v5064_v2  ;;  %vm362_vm7 = vcmp.eq.s32.totalorder %v4019_v57, %v3468_v22  ;;  %v4219_v22 = vsel %vm354_vm3, 1.0, %v5064_v2  ;;  %vm386_vm3 = vcmp.eq.s32.totalorder %v4019_v57, %v3512_v25 }
  0xe1   : > { %1686 = vmatprep.mubr.f32.mxu1 %v5064_v2  ;;  %5116 = vst [vmem:[#allocation36_spill] sm:$0xff] %v4219_v22 }
  0xe3   : > { %1526 = vmatmul.mubr.f32.gmra.mrb[44].mxu0 %v3827_v43 }
  0xe4   : > { %1687 = vmatmul.mubr.f32.gmra.mrb[44].mxu1 %v3827_v43  ;;  %1531 = vmatprep.mubr.f32.mxu0 %v5064_v2  ;;  %v4162_v43 = vsel %vm335_vm8, 1.0, %v5064_v2  ;;  %vm367_vm8 = vcmp.eq.s32.totalorder %v4007_v54, %v3491_v23 }
  0xe5   : > { %1692 = vmatprep.mubr.f32.mxu1 %v5064_v2  ;;  %v4234_v17 = vsel %vm367_vm8, 1.0, %v5064_v2  ;;  %vm399_vm8 = vcmp.eq.s32.totalorder %v4007_v54, %v3543_v27 }
  0xe6   : > { %5121 = vst [vmem:[#allocation41_spill] sm:$0xff] %v4234_v17 }
  0xe7   : > { %1532 = vmatmul.mubr.f32.gmra.mrb[46].mxu0 %v3862_v44 }
  0xe8   : > { %1693 = vmatmul.mubr.f32.gmra.mrb[46].mxu1 %v3862_v44  ;;  %1537 = vmatprep.mubr.f32.mxu0 %v5064_v2  ;;  %v4165_v44 = vsel %vm337_vm9, 1.0, %v5064_v2  ;;  %vm369_vm9 = vcmp.eq.s32.totalorder %v4011_v55, %v3491_v23 }
  0xe9   : > { %1698 = vmatprep.mubr.f32.mxu1 %v5064_v2  ;;  %v4237_v21 = vsel %vm369_vm9, 1.0, %v5064_v2  ;;  %vm401_vm9 = vcmp.eq.s32.totalorder %v4011_v55, %v3543_v27 }
  0xea   : > { %5122 = vst [vmem:[#allocation42_spill] sm:$0xff] %v4237_v21 }
  0xeb   : > { %1538 = vmatmul.mubr.f32.gmra.mrb[48].mxu0 %v3889_v45 }
  0xec   : > { %1699 = vmatmul.mubr.f32.gmra.mrb[48].mxu1 %v3889_v45  ;;  %1543 = vmatprep.mubr.f32.mxu0 %v5064_v2  ;;  %v4168_v45 = vsel %vm336_vm10, 1.0, %v5064_v2  ;;  %vm368_vm10 = vcmp.eq.s32.totalorder %v4015_v56, %v3491_v23 }
  0xed   : > { %1704 = vmatprep.mubr.f32.mxu1 %v5064_v2  ;;  %v4240_v22 = vsel %vm368_vm10, 1.0, %v5064_v2  ;;  %vm400_vm10 = vcmp.eq.s32.totalorder %v4015_v56, %v3543_v27 }
  0xee   : > { %5123 = vst [vmem:[#allocation43_spill] sm:$0xff] %v4240_v22 }
  0xef   : > { %1544 = vmatmul.mubr.f32.gmra.mrb[50].mxu0 %v3897_v46 }
  0xf0   : > { %1705 = vmatmul.mubr.f32.gmra.mrb[50].mxu1 %v3897_v46  ;;  %1549 = vmatprep.mubr.f32.mxu0 %v5064_v2  ;;  %v4171_v46 = vsel %vm338_vm11, 1.0, %v5064_v2  ;;  %vm370_vm11 = vcmp.eq.s32.totalorder %v4019_v57, %v3491_v23  ;;  %v4231_v23 = vsel %vm362_vm7, 1.0, %v5064_v2  ;;  %vm394_vm7 = vcmp.eq.s32.totalorder %v4019_v57, %v3520_v26 }
  0xf1   : > { %1710 = vmatprep.mubr.f32.mxu1 %v5064_v2  ;;  %5120 = vst [vmem:[#allocation40_spill] sm:$0xff] %v4231_v23  ;;  %v4243_v20 = vsel %vm370_vm11, 1.0, %v5064_v2  ;;  %vm402_vm11 = vcmp.eq.s32.totalorder %v4019_v57, %v3543_v27 }
  0xf2   : > { %5124 = vst [vmem:[#allocation44_spill] sm:$0xff] %v4243_v20 }
  0xf3   : > { %1550 = vmatmul.mubr.f32.gmra.mrb[52].mxu0 %v3903_v47 }
  0xf4   : > { %1711 = vmatmul.mubr.f32.gmra.mrb[52].mxu1 %v3903_v47  ;;  %1555 = vmatprep.mubr.f32.mxu0 %v5064_v2  ;;  %v4174_v47 = vsel %vm343_vm12, 1.0, %v5064_v2  ;;  %vm375_vm12 = vcmp.eq.s32.totalorder %v4007_v54, %v3494_v24 }
  0xf5   : > { %1716 = vmatprep.mubr.f32.mxu1 %v5064_v2  ;;  %v4246_v19 = vsel %vm375_vm12, 1.0, %v5064_v2  ;;  %vm407_vm12 = vcmp.eq.s32.totalorder %v4007_v54, %v3546_v28 }
  0xf6   : > { %5125 = vst [vmem:[#allocation45_spill] sm:$0xff] %v4246_v19  ;;  %v5127_v19 = vmov 0.0  }
  0xf7   : > { %1556 = vmatmul.mubr.f32.gmra.mrb[54].mxu0 %v3909_v48  ;;  %v4300_v23 = vsel %vm384_vm2, 1.0, %v5127_v19 }
  0xf8   : > { %1717 = vmatmul.mubr.f32.gmra.mrb[54].mxu1 %v3909_v48  ;;  %1561 = vmatprep.mubr.f32.mxu0 %v5064_v2  ;;  %v4177_v48 = vsel %vm345_vm13, 1.0, %v5064_v2  ;;  %vm377_vm13 = vcmp.eq.s32.totalorder %v4011_v55, %v3494_v24  ;;  %5132 = vst [vmem:[#allocation51_spill] sm:$0xff] %v4300_v23  ;;  %v4321_v23 = vsel %vm401_vm9, 1.0, %v5127_v19 }
  0xf9   : > { %1722 = vmatprep.mubr.f32.mxu1 %v5064_v2  ;;  %5110 = vst [vmem:[#allocation30_spill] sm:$0xff] %v4177_v48  ;;  %v4249_v18 = vsel %vm377_vm13, 1.0, %v5064_v2  ;;  %5139 = vst [vmem:[#allocation58_spill] sm:$0xff] %v4321_v23  ;;  %vm409_vm13 = vcmp.eq.s32.totalorder %v4011_v55, %v3546_v28 }
  0xfa   : > { %5126 = vst [vmem:[#allocation46_spill] sm:$0xff] %v4249_v18 }
  0xfb   : > { %1562 = vmatmul.mubr.f32.gmra.mrb[56].mxu0 %v3915_v49 }
  0xfc   : > { %1723 = vmatmul.mubr.f32.gmra.mrb[56].mxu1 %v3915_v49  ;;  %1567 = vmatprep.mubr.f32.mxu0 %v5064_v2  ;;  %v4180_v49 = vsel %vm344_vm14, 1.0, %v5064_v2  ;;  %vm376_vm14 = vcmp.eq.s32.totalorder %v4015_v56, %v3494_v24 }
  0xfd   : > { %1728 = vmatprep.mubr.f32.mxu1 %v5064_v2  ;;  %5111 = vst [vmem:[#allocation31_spill] sm:$0xff] %v4180_v49  ;;  %v4270_v22 = vsel %vm376_vm14, 1.0, %v5127_v19  ;;  %vm408_vm14 = vcmp.eq.s32.totalorder %v4015_v56, %v3546_v28 }
  0xfe   : > { %5128 = vst [vmem:[#allocation47_spill] sm:$0xff] %v4270_v22 }
  0xff   : > { %1568 = vmatmul.mubr.f32.gmra.mrb[58].mxu0 %v3921_v50 }
 0x100   : > { %1729 = vmatmul.mubr.f32.gmra.mrb[58].mxu1 %v3921_v50  ;;  %1573 = vmatprep.mubr.f32.mxu0 %v5064_v2  ;;  %v4183_v50 = vsel %vm346_vm15, 1.0, %v5064_v2  ;;  %vm378_vm15 = vcmp.eq.s32.totalorder %v4019_v57, %v3494_v24  ;;  %v4303_v24 = vsel %vm386_vm3, 1.0, %v5127_v19 }
 0x101   : > { %1734 = vmatprep.mubr.f32.mxu1 %v5064_v2  ;;  %5112 = vst [vmem:[#allocation32_spill] sm:$0xff] %v4183_v50  ;;  %v4282_v17 = vsel %vm378_vm15, 1.0, %v5127_v19  ;;  %5133 = vst [vmem:[#allocation52_spill] sm:$0xff] %v4303_v24  ;;  %vm410_vm15 = vcmp.eq.s32.totalorder %v4019_v57, %v3546_v28  ;;  %v5155_v28 = vld [vmem:[#allocation43_spill] sm:$0xff] }
 0x102   : > { %5129 = vst [vmem:[#allocation48_spill] sm:$0xff] %v4282_v17  ;;  %v4306_v17 = vsel %vm391_vm4, 1.0, %v5127_v19 }
 0x103   : > { %1574 = vmatmul.mubr.f32.gmra.mrb[60].mxu0 %v3927_v51  ;;  %5134 = vst [vmem:[#allocation53_spill] sm:$0xff] %v4306_v17 }
 0x104   : > { %1735 = vmatmul.mubr.f32.gmra.mrb[60].mxu1 %v3927_v51  ;;  %1579 = vmatprep.mubr.f32.mxu0 %v5064_v2  ;;  %v4186_v51 = vsel %vm351_vm0, 1.0, %v5064_v2  ;;  %vm383_vm0 = vcmp.eq.s32.totalorder %v4007_v54, %v3512_v25 }
 0x105   : > { %1740 = vmatprep.mubr.f32.mxu1 %v5064_v2  ;;  %5113 = vst [vmem:[#allocation33_spill] sm:$0xff] %v4186_v51  ;;  %v4288_v22 = vsel %vm383_vm0, 1.0, %v5127_v19 }
 0x106   : > { %5130 = vst [vmem:[#allocation49_spill] sm:$0xff] %v4288_v22  ;;  %v4309_v22 = vsel %vm393_vm5, 1.0, %v5127_v19 }
 0x107   : > { %1580 = vmatmul.mubr.f32.gmra.mrb[62].mxu0 %v3933_v52  ;;  %5135 = vst [vmem:[#allocation54_spill] sm:$0xff] %v4309_v22 }
 0x108   : > { %1741 = vmatmul.mubr.f32.gmra.mrb[62].mxu1 %v3933_v52  ;;  %v4189_v52 = vsel %vm353_vm1, 1.0, %v5064_v2  ;;  %vm385_vm1 = vcmp.eq.s32.totalorder %v4011_v55, %v3512_v25  ;;  %v4318_v25 = vsel %vm399_vm8, 1.0, %v5127_v19  ;;  %v4378_v55 = vsel %vm408_vm14, 1.0, %v5127_v19 }
 0x109   : > { %5114 = vst [vmem:[#allocation34_spill] sm:$0xff] %v4189_v52  ;;  %v4294_v26 = vsel %vm385_vm1, 1.0, %v5127_v19  ;;  %v4312_v52 = vsel %vm392_vm6, 1.0, %v5127_v19  ;;  %5138 = vst [vmem:[#allocation57_spill] sm:$0xff] %v4318_v25 }
 0x10a   : > { %5131 = vst [vmem:[#allocation50_spill] sm:$0xff] %v4294_v26  ;;  %5136 = vst [vmem:[#allocation55_spill] sm:$0xff] %v4312_v52  ;;  %v4315_v26 = vsel %vm394_vm7, 1.0, %v5127_v19 }
 0x10b   : > { %5137 = vst [vmem:[#allocation56_spill] sm:$0xff] %v4315_v26 }
 0x15e   : > { %v1169_v20 = vpop.f32.mrb[0].mxu0 }
 0x15f   : > { %v1330_v2 = vpop.f32.mrb[0].mxu1  ;;  %v1171_v18 = vpop.f32.mrb[1].mxu0  ;;  %v1747_v17 = vmul.f32 %v4042_v58, %v1169_v20 }
 0x160   : > { %v1332_v21 = vpop.f32.mrb[1].mxu1  ;;  %v1749_v25 = vmul.f32 %v4045_v59, %v1330_v2  ;;  %v1748_v23 = vmul.f32 %v4048_v60, %v1171_v18  ;;  %v4343_v2 = vsel %vm400_vm10, 1.0, %v5127_v19  ;;  %v4346_v18 = vsel %vm402_vm11, 1.0, %v5127_v19 }
 0x161   : > { %v1750_v58 = vmul.f32 %v4051_v61, %v1332_v21 }
 0x162   : > { %v1175_v51 = vpop.f32.mrb[2].mxu0 }
 0x163   : > { %v1755_v22 = vmul.f32 %v4054_v62, %v1175_v51  ;;  %v1336_v24 = vpop.f32.mrb[2].mxu1  ;;  %v1177_v50 = vpop.f32.mrb[3].mxu0 }
 0x164   : > { %v1757_v26 = vmul.f32 %v4057_v63, %v1336_v24  ;;  %v1756_v52 = vmul.f32 %v4060_v0, %v1177_v50  ;;  %v1338_v20 = vpop.f32.mrb[3].mxu1  ;;  %v4349_v24 = vld [vmem:[%s3336_s30 + $0x10] sm:$0xff]  ;;  %v4375_v63 = vrot.slane %v4003_v53, %v3568_v31 }
 0x165   : > { %v1875_v62 = vadd.f32 %v1755_v22, %v1747_v17  ;;  %v1758_v51 = vmul.f32 %v4063_v1, %v1338_v20  ;;  %v199_v56 = vrot.slane %v4349_v24, %v3364_v8 }
 0x166   : > { %v1917_v49 = vadd.f32 %v1757_v26, %v1749_v25  ;;  %v1896_v48 = vadd.f32 %v1756_v52, %v1748_v23  ;;  %v1181_v14 = vpop.f32.mrb[4].mxu0  ;;  %v4356_v23 = vsel %vm407_vm12, 1.0, %v5127_v19  ;;  %v4386_v52 = vsel %vm410_vm15, 1.0, %v5127_v19 }
 0x167   : > { %v1938_v17 = vadd.f32 %v1758_v51, %v1750_v58  ;;  %v1763_v21 = vmul.f32 %v4066_v4, %v1181_v14  ;;  %v1342_v22 = vpop.f32.mrb[4].mxu1  ;;  %v1183_v59 = vpop.f32.mrb[5].mxu0  ;;  %v4366_v14 = vsel %vm409_vm13, 1.0, %v5127_v19  ;;  %vm291_vm0 = vcmp.eq.s32.totalorder %v4375_v63, %v3349_v3 }
 0x168   : > { %v1765_v25 = vmul.f32 %v4069_v11, %v1342_v22  ;;  %v1764_v26 = vmul.f32 %v4090_v12, %v1183_v59  ;;  %v1344_v60 = vpop.f32.mrb[5].mxu1  ;;  %v4382_v11 = vrot.slane %v4003_v53, %v3582_v32  ;;  %v211_v59 = vrot.slane %v4349_v24, %v3361_v7 }
 0x169   : > { %v1876_v54 = vadd.f32 %v1875_v62, %v1763_v21  ;;  %v1766_v61 = vmul.f32 %v4099_v13, %v1344_v60  ;;  %v207_v62 = vrot.slane %v4349_v24, %v3367_v9  ;;  %v203_v21 = vrot.slane %v4349_v24, %v3355_v5  ;;  %v5153_v5 = vld [vmem:[#allocation41_spill] sm:$0xff] }
 0x16a   : > { %v1918_v0 = vadd.f32 %v1917_v49, %v1765_v25  ;;  %v1897_v1 = vadd.f32 %v1896_v48, %v1764_v26  ;;  %v1187_v4 = vpop.f32.mrb[6].mxu0  ;;  %v4390_v49 = vrot.slane %v4003_v53, %v3549_v29  ;;  %vm293_vm1 = vcmp.eq.s32.totalorder %v4382_v11, %v3349_v3 }
 0x16b   : > { %v1939_v57 = vadd.f32 %v1938_v17, %v1766_v61  ;;  %v1771_v12 = vmul.f32 %v4102_v15, %v1187_v4  ;;  %v1348_v13 = vpop.f32.mrb[6].mxu1  ;;  %v1189_v50 = vpop.f32.mrb[7].mxu0  ;;  %v4398_v15 = vrot.slane %v4003_v53, %v3557_v30  ;;  %3010 = vlog2.f32 %v199_v56 }
 0x16c   : > { %v1773_v48 = vmul.f32 %v4105_v16, %v1348_v13  ;;  %v1772_v20 = vmul.f32 %v4108_v33, %v1189_v50  ;;  %v1350_v58 = vpop.f32.mrb[7].mxu1  ;;  %vm292_vm2 = vcmp.eq.s32.totalorder %v4390_v49, %v3349_v3  ;;  %3012 = vlog2.f32 %v207_v62 }
 0x16d   : > { %v1877_v51 = vadd.f32 %v1876_v54, %v1771_v12  ;;  %v1774_v17 = vmul.f32 %v4111_v34, %v1350_v58  ;;  %v4422_v56 = vsel %vm293_vm1, 1.0, %v5127_v19  ;;  %vm294_vm3 = vcmp.eq.s32.totalorder %v4398_v15, %v3349_v3 }
 0x16e   : > { %v1919_v16 = vadd.f32 %v1918_v0, %v1773_v48  ;;  %v1898_v22 = vadd.f32 %v1897_v1, %v1772_v20  ;;  %v1193_v33 = vpop.f32.mrb[8].mxu0  ;;  %v4418_v0 = vsel %vm291_vm0, 1.0, %v5127_v19  ;;  %3014 = vlog2.f32 %v203_v21 }
 0x16f   : > { %v1940_v53 = vadd.f32 %v1939_v57, %v1774_v17  ;;  %v1779_v25 = vmul.f32 %v4114_v35, %v1193_v33  ;;  %v1354_v26 = vpop.f32.mrb[8].mxu1  ;;  %v1195_v34 = vpop.f32.mrb[9].mxu0  ;;  %v4427_v57 = vsel %vm292_vm2, 1.0, %v5127_v19  ;;  %vm299_vm4 = vcmp.eq.s32.totalorder %v4375_v63, %v3358_v6 }
 0x170   : > { %v1781_v60 = vmul.f32 %v4117_v36, %v1354_v26  ;;  %v1780_v54 = vmul.f32 %v4120_v37, %v1195_v34  ;;  %v1356_v61 = vpop.f32.mrb[9].mxu1  ;;  %vm301_vm5 = vcmp.eq.s32.totalorder %v4382_v11, %v3358_v6  ;;  %3016 = vlog2.f32 %v211_v59 }
 0x171   : > { %v1878_v1 = vadd.f32 %v1877_v51, %v1779_v25  ;;  %v1782_v35 = vmul.f32 %v4123_v38, %v1356_v61  ;;  %v4440_v62 = vsel %vm294_vm3, 1.0, %v5127_v19  ;;  %vm300_vm6 = vcmp.eq.s32.totalorder %v4390_v49, %v3358_v6 }
 0x172   : > { %v1920_v36 = vadd.f32 %v1919_v16, %v1781_v60  ;;  %v1899_v4 = vadd.f32 %v1898_v22, %v1780_v54  ;;  %v1199_v37 = vpop.f32.mrb[10].mxu0  ;;  %vm302_vm7 = vcmp.eq.s32.totalorder %v4398_v15, %v3358_v6  ;;  %v4448_v21 = vsel %vm299_vm4, 1.0, %v5127_v19 }
 0x173   : > { %v1941_v12 = vadd.f32 %v1940_v53, %v1782_v35  ;;  %v1787_v13 = vmul.f32 %v4126_v39, %v1199_v37  ;;  %v1360_v50 = vpop.f32.mrb[10].mxu1  ;;  %v1201_v48 = vpop.f32.mrb[11].mxu0  ;;  %v4451_v16 = vsel %vm301_vm5, 1.0, %v5127_v19  ;;  %vm307_vm8 = vcmp.eq.s32.totalorder %v4375_v63, %v3370_v10 }
 0x174   : > { %v1789_v38 = vmul.f32 %v4129_v40, %v1360_v50  ;;  %v1788_v20 = vmul.f32 %v4150_v41, %v1201_v48  ;;  %v1362_v58 = vpop.f32.mrb[11].mxu1  ;;  %vm309_vm9 = vcmp.eq.s32.totalorder %v4382_v11, %v3370_v10  ;;  %v4464_v34 = vsel %vm300_vm6, 1.0, %v5127_v19  ;;  %v5141_v48 = vld [vmem:[#allocation30_spill] sm:$0xff] }
 0x175   : > { %v1879_v39 = vadd.f32 %v1878_v1, %v1787_v13  ;;  %v1790_v51 = vmul.f32 %v4159_v42, %v1362_v58  ;;  %v3011_v60 = vpop.eup %3010  ;;  %vm308_vm10 = vcmp.eq.s32.totalorder %v4390_v49, %v3370_v10  ;;  %vm310_vm11 = vcmp.eq.s32.totalorder %v4398_v15, %v3370_v10  ;;  %v5140_v13 = vld [vmem:[#allocation16_spill] sm:$0xff] }
 0x176   : > { %v1921_v40 = vadd.f32 %v1920_v36, %v1789_v38  ;;  %v1900_v17 = vadd.f32 %v1899_v4, %v1788_v20  ;;  %v1205_v41 = vpop.f32.mrb[12].mxu0  ;;  %v4481_v6 = vsel %vm307_vm8, 1.0, %v5127_v19  ;;  %vm315_vm12 = vcmp.eq.s32.totalorder %v4375_v63, %v5140_v13  ;;  %v5142_v20 = vld [vmem:[#allocation31_spill] sm:$0xff] }
 0x177   : > { %v1942_v22 = vadd.f32 %v1941_v12, %v1790_v51  ;;  %v1795_v33 = vmul.f32 %v4162_v43, %v1205_v41  ;;  %v1366_v59 = vpop.f32.mrb[12].mxu1  ;;  %v1207_v42 = vpop.f32.mrb[13].mxu0  ;;  %v4470_v43 = vsel %vm302_vm7, 1.0, %v5127_v19  ;;  %vm317_vm13 = vcmp.eq.s32.totalorder %v4382_v11, %v5140_v13 }
 0x178   : > { %v1797_v53 = vmul.f32 %v4165_v44, %v1366_v59  ;;  %v1796_v25 = vmul.f32 %v4168_v45, %v1207_v42  ;;  %v1368_v26 = vpop.f32.mrb[13].mxu1  ;;  %v3013_v44 = vpop.eup %3012  ;;  %v4500_v51 = vsel %vm308_vm10, 1.0, %v5127_v19  ;;  %v4523_v10 = vsel %vm317_vm13, 1.0, %v5127_v19 }
 0x179   : > { %v1880_v54 = vadd.f32 %v1879_v39, %v1795_v33  ;;  %v1798_v61 = vmul.f32 %v4171_v46, %v1368_v26  ;;  %v4487_v46 = vsel %vm309_vm9, 1.0, %v5127_v19  ;;  %v3015_v50 = vpop.eup %3014  ;;  %v4511_v33 = vmul.f32 0.6931472, %v3013_v44 }
 0x17a   : > { %v1922_v45 = vadd.f32 %v1921_v40, %v1797_v53  ;;  %v1901_v1 = vadd.f32 %v1900_v17, %v1796_v25  ;;  %v1211_v35 = vpop.f32.mrb[14].mxu0  ;;  %v5143_v17 = vld [vmem:[#allocation32_spill] sm:$0xff]  ;;  %v3017_v59 = vpop.eup %3016  ;;  %v4517_v26 = vsel %vm315_vm12, 1.0, %v5127_v19  ;;  %vm316_vm14 = vcmp.eq.s32.totalorder %v4390_v49, %v5140_v13 }
 0x17b   : > { %v1943_v36 = vadd.f32 %v1942_v22, %v1798_v61  ;;  %v1803_v4 = vmul.f32 %v4174_v47, %v1211_v35  ;;  %v1372_v37 = vpop.f32.mrb[14].mxu1  ;;  %v1213_v12 = vpop.f32.mrb[15].mxu0  ;;  %v4506_v47 = vsel %vm310_vm11, 1.0, %v5127_v19  ;;  %v4509_v22 = vmul.f32 0.6931472, %v3011_v60 }
 0x17c   : > { %v1805_v38 = vmul.f32 %v5141_v48, %v1372_v37  ;;  %v1804_v58 = vmul.f32 %v5142_v20, %v1213_v12  ;;  %v1374_v39 = vpop.f32.mrb[15].mxu1  ;;  %v5146_v37 = vld [vmem:[#allocation35_spill] sm:$0xff]  ;;  %vm318_vm15 = vcmp.eq.s32.totalorder %v4398_v15, %v5140_v13 }
 0x17d   : > { %v1881_v40 = vadd.f32 %v1880_v54, %v1803_v4  ;;  %v1806_v41 = vmul.f32 %v5143_v17, %v1374_v39  ;;  %v5144_v54 = vld [vmem:[#allocation33_spill] sm:$0xff] }
 0x17e   : > { %v1923_v42 = vadd.f32 %v1922_v45, %v1805_v38  ;;  %v1902_v53 = vadd.f32 %v1901_v1, %v1804_v58  ;;  %v1217_v25 = vpop.f32.mrb[16].mxu0  ;;  %v2787_v45 = vadd.f32 -4.6051702, %v4509_v22  ;;  %v5145_v1 = vld [vmem:[#allocation34_spill] sm:$0xff]  ;;  %v4529_v38 = vmul.f32 0.6931472, %v3015_v50 }
 0x17f   : > { %v1944_v60 = vadd.f32 %v1943_v36, %v1806_v41  ;;  %v1811_v61 = vmul.f32 %v5144_v54, %v1217_v25  ;;  %v1378_v44 = vpop.f32.mrb[16].mxu1  ;;  %v1219_v35 = vpop.f32.mrb[17].mxu0  ;;  %v5147_v58 = vld [vmem:[#allocation36_spill] sm:$0xff]  ;;  %v2789_v36 = vadd.f32 -4.6051702, %v4511_v33 }
 0x180   : > { %v1813_v4 = vmul.f32 %v5145_v1, %v1378_v44  ;;  %v1812_v12 = vmul.f32 %v5146_v37, %v1219_v35  ;;  %v1380_v48 = vpop.f32.mrb[17].mxu1  ;;  %v3193_v54 = vmov 1966171168   ;;  %v4537_v35 = vmul.f32 0.6931472, %v3017_v59  ;;  %v5148_v1 = vld [vmem:[#allocation37_spill] sm:$0xff] }
 0x181   : > { %v1882_v20 = vadd.f32 %v1881_v40, %v1811_v61  ;;  %v1814_v39 = vmul.f32 %v5147_v58, %v1380_v48  ;;  %v2121_v44 = vunpack.c.l.s4 %v3193_v54  ;;  %v2067_v40 = vmul.f32 0.75, %v2787_v45  ;;  %v5149_v48 = vld [vmem:[#allocation38_spill] sm:$0xff]  ;;  %v5151_v58 = vld [vmem:[#allocation17_spill] sm:$0xff] }
 0x182   : > { %v1924_v17 = vadd.f32 %v1923_v42, %v1813_v4  ;;  %v1903_v41 = vadd.f32 %v1902_v53, %v1812_v12  ;;  %v1223_v25 = vpop.f32.mrb[18].mxu0  ;;  %v4544_v61 = vsel %vm316_vm14, 1.0, %v5127_v19  ;;  %v5150_v53 = vld [vmem:[#allocation39_spill] sm:$0xff]  ;;  %v2788_v59 = vadd.f32 -4.6051702, %v4529_v38 }
 0x183   : > { %v1945_v50 = vadd.f32 %v1944_v60, %v1814_v39  ;;  %v1819_v37 = vmul.f32 %v5148_v1, %v1223_v25  ;;  %v1384_v7 = vpop.f32.mrb[18].mxu1  ;;  %v1225_v9 = vpop.f32.mrb[19].mxu0  ;;  %vm323_vm0 = vcmp.eq.s32.totalorder %v4375_v63, %v5151_v58  ;;  %v5152_v39 = vld [vmem:[#allocation40_spill] sm:$0xff]  ;;  %v2069_v45 = vmul.f32 0.75, %v2789_v36 }
 0x184   : > { %v1821_v42 = vmul.f32 %v5149_v48, %v1384_v7  ;;  %v1820_v4 = vmul.f32 %v5150_v53, %v1225_v9  ;;  %v1386_v12 = vpop.f32.mrb[19].mxu1  ;;  %v4556_v54 = vsel %vm318_vm15, 1.0, %v5127_v19  ;;  %v2122_v9 = vunpack.c.0.s8 %v2121_v44 }
 0x185   : > { %v1883_v60 = vadd.f32 %v1882_v20, %v1819_v37  ;;  %v1822_v25 = vmul.f32 %v5152_v39, %v1386_v12  ;;  %vm325_vm1 = vcmp.eq.s32.totalorder %v4382_v11, %v5151_v58  ;;  %v2075_v12 = vmul.f32 1.442695, %v2067_v40  ;;  %v5154_v39 = vld [vmem:[#allocation42_spill] sm:$0xff] }
 0x186   : > { %v1925_v1 = vadd.f32 %v1924_v17, %v1821_v42  ;;  %v1904_v7 = vadd.f32 %v1903_v41, %v1820_v4  ;;  %v1229_v48 = vpop.f32.mrb[20].mxu0  ;;  %v4562_v36 = vsel %vm323_vm0, 1.0, %v5127_v19  ;;  %v2068_v41 = vmul.f32 0.75, %v2788_v59  ;;  %v5156_v42 = vld [vmem:[#allocation44_spill] sm:$0xff]  ;;  %v5157_v59 = vld [vmem:[#allocation45_spill] sm:$0xff] }
 0x187   : > { %v1946_v53 = vadd.f32 %v1945_v50, %v1822_v25  ;;  %v1827_v8 = vmul.f32 %v5153_v5, %v1229_v48  ;;  %v1390_v20 = vpop.f32.mrb[20].mxu1  ;;  %v1231_v37 = vpop.f32.mrb[21].mxu0  ;;  %vm324_vm2 = vcmp.eq.s32.totalorder %v4390_v49, %v5151_v58  ;;  %v2079_v4 = vmul.f32 1.442695, %v2069_v45 }
 0x188   : > { %v1829_v13 = vmul.f32 %v5154_v39, %v1390_v20  ;;  %v1828_v27 = vmul.f32 %v5155_v28, %v1231_v37  ;;  %v1392_v17 = vpop.f32.mrb[21].mxu1  ;;  %v4570_v5 = vsel %vm325_vm1, 1.0, %v5127_v19  ;;  %v4573_v30 = vsub.s32 %v2122_v9, %v3349_v3  ;;  %v5158_v39 = vld [vmem:[#allocation46_spill] sm:$0xff] }
 0x189   : > { %v1884_v44 = vadd.f32 %v1883_v60, %v1827_v8  ;;  %v1830_v50 = vmul.f32 %v5156_v42, %v1392_v17  ;;  %vm326_vm3 = vcmp.eq.s32.totalorder %v4398_v15, %v5151_v58  ;;  %v2790_v60 = vadd.f32 -4.6051702, %v4537_v35  ;;  %v5160_v17 = vld [vmem:[#allocation48_spill] sm:$0xff]  ;;  %v5161_v42 = vld [vmem:[#allocation18_spill] sm:$0xff] }
 0x18a   : > { %v1926_v40 = vadd.f32 %v1925_v1, %v1829_v13  ;;  %v1905_v25 = vadd.f32 %v1904_v7, %v1828_v27  ;;  %v1235_v48 = vpop.f32.mrb[22].mxu0  ;;  %v4580_v45 = vsel %vm324_vm2, 1.0, %v5127_v19  ;;  %v5159_v27 = vld [vmem:[#allocation47_spill] sm:$0xff]  ;;  %3018 = vpow2.f32 %v2075_v12 }
 0x18b   : > { %v1947_v28 = vadd.f32 %v1946_v53, %v1830_v50  ;;  %v1835_v20 = vmul.f32 %v5157_v59, %v1235_v48  ;;  %v1396_v37 = vpop.f32.mrb[22].mxu1  ;;  %v1237_v8 = vpop.f32.mrb[23].mxu0  ;;  %v2077_v3 = vmul.f32 1.442695, %v2068_v41  ;;  %v4586_v53 = vsel %vm326_vm3, 1.0, %v5127_v19 }
 0x18c   : > { %v1837_v1 = vmul.f32 %v5158_v39, %v1396_v37  ;;  %v1836_v7 = vmul.f32 %v5159_v27, %v1237_v8  ;;  %v1398_v13 = vpop.f32.mrb[23].mxu1  ;;  %vm331_vm4 = vcmp.eq.s32.totalorder %v4375_v63, %v5161_v42  ;;  %3020 = vpow2.f32 %v2079_v4  ;;  %v5162_v8 = vld [vmem:[#allocation49_spill] sm:$0xff]  ;;  %v5163_v39 = vld [vmem:[#allocation50_spill] sm:$0xff] }
 0x18d   : > { %v1885_v9 = vadd.f32 %v1884_v44, %v1835_v20  ;;  %v1838_v58 = vmul.f32 %v5160_v17, %v1398_v13  ;;  %vm333_vm5 = vcmp.eq.s32.totalorder %v4382_v11, %v5161_v42  ;;  %v2070_v20 = vmul.f32 0.75, %v2790_v60  ;;  %v5164_v13 = vld [vmem:[#allocation51_spill] sm:$0xff] }
 0x18e   : > { %v1927_v50 = vadd.f32 %v1926_v40, %v1837_v1  ;;  %v1906_v48 = vadd.f32 %v1905_v25, %v1836_v7  ;;  %v1241_v59 = vpop.f32.mrb[24].mxu0  ;;  %vm332_vm6 = vcmp.eq.s32.totalorder %v4390_v49, %v5161_v42  ;;  %3022 = vpow2.f32 %v2077_v3  ;;  %v5166_v60 = vld [vmem:[#allocation19_spill] sm:$0xff] }
 0x18f   : > { %v1948_v37 = vadd.f32 %v1947_v28, %v1838_v58  ;;  %v1843_v12 = vmul.f32 %v5162_v8, %v1241_v59  ;;  %v1402_v41 = vpop.f32.mrb[24].mxu1  ;;  %v1243_v44 = vpop.f32.mrb[25].mxu0  ;;  %v4601_v4 = vsel %vm331_vm4, 1.0, %v5127_v19  ;;  %v5165_v28 = vld [vmem:[#allocation52_spill] sm:$0xff]  ;;  %vm334_vm7 = vcmp.eq.s32.totalorder %v4398_v15, %v5161_v42  ;;  %v5167_v8 = vld [vmem:[#allocation53_spill] sm:$0xff] }
 0x190   : > { %v1845_v27 = vmul.f32 %v5163_v39, %v1402_v41  ;;  %v1844_v17 = vmul.f32 %v5164_v13, %v1243_v44  ;;  %v1404_v40 = vpop.f32.mrb[25].mxu1  ;;  %vm339_vm8 = vcmp.eq.s32.totalorder %v4375_v63, %v5166_v60  ;;  %v4612_v3 = vsel %vm333_vm5, 1.0, %v5127_v19  ;;  %v5169_v13 = vld [vmem:[#allocation55_spill] sm:$0xff] }
 0x191   : > { %v1886_v25 = vadd.f32 %v1885_v9, %v1843_v12  ;;  %v1846_v1 = vmul.f32 %v5165_v28, %v1404_v40  ;;  %vm341_vm9 = vcmp.eq.s32.totalorder %v4382_v11, %v5166_v60  ;;  %v2081_v39 = vmul.f32 1.442695, %v2070_v20 }
 0x192   : > { %v1928_v7 = vadd.f32 %v1927_v50, %v1845_v27  ;;  %v1907_v58 = vadd.f32 %v1906_v48, %v1844_v17  ;;  %v1247_v59 = vpop.f32.mrb[26].mxu0  ;;  %v4621_v50 = vsel %vm332_vm6, 1.0, %v5127_v19  ;;  %v5168_v48 = vld [vmem:[#allocation54_spill] sm:$0xff]  ;;  %v4635_v20 = vsel %vm339_vm8, 1.0, %v5127_v19 }
 0x193   : > { %v1949_v9 = vadd.f32 %v1948_v37, %v1846_v1  ;;  %v1851_v12 = vmul.f32 %v5167_v8, %v1247_v59  ;;  %v1408_v41 = vpop.f32.mrb[26].mxu1  ;;  %v1249_v44 = vpop.f32.mrb[27].mxu0  ;;  %v4629_v37 = vsel %vm334_vm7, 1.0, %v5127_v19  ;;  %5170 = vst [vmem:[#allocation16_spill] sm:$0xff] %v4635_v20  ;;  %v5171_v1 = vld [vmem:[#allocation56_spill] sm:$0xff]  ;;  %v4639_v8 = vsel %vm341_vm9, 1.0, %v5127_v19 }
 0x194   : > { %v1853_v27 = vmul.f32 %v5168_v48, %v1408_v41  ;;  %v1852_v17 = vmul.f32 %v5169_v13, %v1249_v44  ;;  %v1410_v40 = vpop.f32.mrb[27].mxu1  ;;  %5172 = vst [vmem:[#allocation30_spill] sm:$0xff] %v4639_v8  ;;  %vm340_vm10 = vcmp.eq.s32.totalorder %v4390_v49, %v5166_v60  ;;  %v4643_v41 = vpop.eup %3018  ;;  %vm342_vm11 = vcmp.eq.s32.totalorder %v4398_v15, %v5166_v60  ;;  %v5174_v13 = vld [vmem:[#allocation20_spill] sm:$0xff] }
 0x195   : > { %v1887_v28 = vadd.f32 %v1886_v25, %v1851_v12  ;;  %v1854_v59 = vmul.f32 %v5171_v1, %v1410_v40  ;;  %5173 = vst [vmem:[#allocation31_spill] sm:$0xff] %v4643_v41  ;;  %vm347_vm12 = vcmp.eq.s32.totalorder %v4375_v63, %v5174_v13  ;;  %v5175_v12 = vld [vmem:[#allocation57_spill] sm:$0xff]  ;;  %3024 = vpow2.f32 %v2081_v39 }
 0x196   : > { %v1929_v42 = vadd.f32 %v1928_v7, %v1853_v27  ;;  %v1908_v44 = vadd.f32 %v1907_v58, %v1852_v17  ;;  %v1253_v48 = vpop.f32.mrb[28].mxu0  ;;  %vm349_vm13 = vcmp.eq.s32.totalorder %v4382_v11, %v5174_v13  ;;  %v4652_v8 = vpop.eup %3020  ;;  %v5177_v7 = vld [vmem:[#allocation58_spill] sm:$0xff]  ;;  %vm348_vm14 = vcmp.eq.s32.totalorder %v4390_v49, %v5174_v13  ;;  %v5184_v41 = vld [vmem:[#allocation21_spill] sm:$0xff] }
 0x197   : > { %v1950_v25 = vadd.f32 %v1949_v9, %v1854_v59  ;;  %v1859_v40 = vmul.f32 %v5175_v12, %v1253_v48  ;;  %v1414_v1 = vpop.f32.mrb[28].mxu1  ;;  %v1255_v20 = vpop.f32.mrb[29].mxu0  ;;  %5176 = vst [vmem:[#allocation32_spill] sm:$0xff] %v4652_v8  ;;  %v4660_v9 = vsel %vm340_vm10, 1.0, %v5127_v19  ;;  %v4669_v48 = vsel %vm342_vm11, 1.0, %v5127_v19 }
 0x198   : > { %v1861_v58 = vmul.f32 %v5177_v7, %v1414_v1  ;;  %v1860_v27 = vmul.f32 %v4343_v2, %v1255_v20  ;;  %v1416_v17 = vpop.f32.mrb[29].mxu1  ;;  %5178 = vst [vmem:[#allocation33_spill] sm:$0xff] %v4660_v9  ;;  %5179 = vst [vmem:[#allocation34_spill] sm:$0xff] %v4669_v48  ;;  %v4675_v2 = vsel %vm347_vm12, 1.0, %v5127_v19  ;;  %v4677_v20 = vpop.eup %3022  ;;  %vm350_vm15 = vcmp.eq.s32.totalorder %v4398_v15, %v5174_v13 }
 0x199   : > { %v1888_v39 = vadd.f32 %v1887_v28, %v1859_v40  ;;  %v1862_v59 = vmul.f32 %v4346_v18, %v1416_v17  ;;  %5180 = vst [vmem:[#allocation35_spill] sm:$0xff] %v4675_v2  ;;  %5181 = vst [vmem:[#allocation36_spill] sm:$0xff] %v4677_v20  ;;  %v4680_v28 = vsel %vm349_vm13, 1.0, %v5127_v19  ;;  %v4686_v8 = vsel %vm348_vm14, 1.0, %v5127_v19 }
 0x19a   : > { %v1930_v12 = vadd.f32 %v1929_v42, %v1861_v58  ;;  %v1909_v1 = vadd.f32 %v1908_v44, %v1860_v27  ;;  %v1259_v7 = vpop.f32.mrb[30].mxu0  ;;  %5182 = vst [vmem:[#allocation37_spill] sm:$0xff] %v4680_v28  ;;  %5183 = vst [vmem:[#allocation38_spill] sm:$0xff] %v4686_v8  ;;  %vm355_vm0 = vcmp.eq.s32.totalorder %v4375_v63, %v5184_v41  ;;  %v5185_v27 = vld [vmem:[#allocation22_spill] sm:$0xff] }
 0x19b   : > { %v1951_v18 = vadd.f32 %v1950_v25, %v1862_v59  ;;  %v1867_v60 = vmul.f32 %v4356_v23, %v1259_v7  ;;  %v1420_v40 = vpop.f32.mrb[30].mxu1  ;;  %v1261_v17 = vpop.f32.mrb[31].mxu0  ;;  %vm357_vm1 = vcmp.eq.s32.totalorder %v4382_v11, %v5184_v41  ;;  %vm356_vm2 = vcmp.eq.s32.totalorder %v4390_v49, %v5184_v41 }
 0x19c   : > { %v1869_v42 = vmul.f32 %v4366_v14, %v1420_v40  ;;  %v1868_v44 = vmul.f32 %v4378_v55, %v1261_v17  ;;  %v1422_v58 = vpop.f32.mrb[31].mxu1  ;;  %vm358_vm3 = vcmp.eq.s32.totalorder %v4398_v15, %v5184_v41  ;;  %vm363_vm4 = vcmp.eq.s32.totalorder %v4375_v63, %v5185_v27 }
 0x19d   : > { %v1889_v23 = vadd.f32 %v1888_v39, %v1867_v60  ;;  %v1870_v25 = vmul.f32 %v4386_v52, %v1422_v58  ;;  %v4705_v55 = vsel %vm350_vm15, 1.0, %v5127_v19  ;;  %v4708_v40 = vsel %vm355_vm0, 1.0, %v5127_v19 }
 0x19e   : > { %v1931_v59 = vadd.f32 %v1930_v12, %v1869_v42  ;;  %v1910_v14 = vadd.f32 %v1909_v1, %v1868_v44  ;;  %v1491_v7 = vpop.f32.mrb[32].mxu0  ;;  %5186 = vst [vmem:[#allocation39_spill] sm:$0xff] %v4705_v55  ;;  %5187 = vst [vmem:[#allocation17_spill] sm:$0xff] %v4708_v40  ;;  %v4711_v58 = vsel %vm357_vm1, 1.0, %v5127_v19  ;;  %v4714_v12 = vsel %vm356_vm2, 1.0, %v5127_v19 }
 0x19f   : > { %v1890_v39 = vrot.slane %v1889_v23, 4  ;;  %v1952_v52 = vadd.f32 %v1951_v18, %v1870_v25  ;;  %v1652_v60 = vpop.f32.mrb[32].mxu1  ;;  %v1493_v17 = vpop.f32.mrb[33].mxu0  ;;  %5188 = vst [vmem:[#allocation40_spill] sm:$0xff] %v4711_v58  ;;  %5189 = vst [vmem:[#allocation41_spill] sm:$0xff] %v4714_v12  ;;  %v4720_v13 = vsel %vm358_vm3, 1.0, %v5127_v19  ;;  %v1751_v12 = vmul.f32 %v4418_v0, %v1491_v7 }
 0x1a0   : > { %v1932_v1 = vrot.slane %v1931_v59, 4  ;;  %v1911_v42 = vrot.slane %v1910_v14, 4  ;;  %v1654_v44 = vpop.f32.mrb[33].mxu1  ;;  %5190 = vst [vmem:[#allocation42_spill] sm:$0xff] %v4720_v13  ;;  %v4726_v18 = vsel %vm363_vm4, 1.0, %v5127_v19  ;;  %v4728_v25 = vpop.eup %3024  ;;  %v1753_v41 = vmul.f32 %v4422_v56, %v1652_v60 }
 0x1a1   : > { %5191 = vst [vmem:[#allocation43_spill] sm:$0xff] %v4726_v18  ;;  %5192 = vst [vmem:[#allocation44_spill] sm:$0xff] %v4728_v25  ;;  %v1891_v20 = vadd.f32 %v1890_v39, %v1889_v23  ;;  %v1953_v58 = vrot.slane %v1952_v52, 4  ;;  %v1752_v13 = vmul.f32 %v4427_v57, %v1493_v17  ;;  %v1754_v18 = vmul.f32 %v4440_v62, %v1654_v44 }
 0x1a2   : > { %v1933_v55 = vadd.f32 %v1932_v1, %v1931_v59  ;;  %v1912_v8 = vadd.f32 %v1911_v42, %v1910_v14  ;;  %v1497_v28 = vpop.f32.mrb[34].mxu0  ;;  %vm365_vm5 = vcmp.eq.s32.totalorder %v4382_v11, %v5185_v27  ;;  %vm364_vm6 = vcmp.eq.s32.totalorder %v4390_v49, %v5185_v27 }
 0x1a3   : > { %v1892_v2 = vrot.slane %v1891_v20, 2  ;;  %v1954_v48 = vadd.f32 %v1953_v58, %v1952_v52  ;;  %v1759_v25 = vmul.f32 %v4448_v21, %v1497_v28  ;;  %v1658_v23 = vpop.f32.mrb[34].mxu1  ;;  %v1499_v39 = vpop.f32.mrb[35].mxu0  ;;  %vm366_vm7 = vcmp.eq.s32.totalorder %v4398_v15, %v5185_v27 }
 0x1a4   : > { %v1934_v9 = vrot.slane %v1933_v55, 2  ;;  %v1913_v0 = vrot.slane %v1912_v8, 2  ;;  %v1761_v7 = vmul.f32 %v4451_v16, %v1658_v23  ;;  %v1760_v59 = vmul.f32 %v4464_v34, %v1499_v39  ;;  %v1660_v14 = vpop.f32.mrb[35].mxu1 }
 0x1a5   : > { %v1893_v1 = vadd.f32 %v1892_v2, %v1891_v20  ;;  %v1955_v56 = vrot.slane %v1954_v48, 2  ;;  %v1959_v60 = vadd.f32 %v1759_v25, %v1751_v12  ;;  %v1762_v57 = vmul.f32 %v4470_v43, %v1660_v14 }
 0x1a6   : > { %v1935_v17 = vadd.f32 %v1934_v9, %v1933_v55  ;;  %v1914_v52 = vadd.f32 %v1913_v0, %v1912_v8  ;;  %v2001_v58 = vadd.f32 %v1761_v7, %v1753_v41  ;;  %v1980_v62 = vadd.f32 %v1760_v59, %v1752_v13  ;;  %v1503_v42 = vpop.f32.mrb[36].mxu0 }
 0x1a7   : > { %v1894_v21 = vrot.slane %v1893_v1, 1  ;;  %v1956_v28 = vadd.f32 %v1955_v56, %v1954_v48  ;;  %v2022_v44 = vadd.f32 %v1762_v57, %v1754_v18  ;;  %v1767_v40 = vmul.f32 %v4481_v6, %v1503_v42  ;;  %v1664_v19 = vpop.f32.mrb[36].mxu1  ;;  %v1505_v16 = vpop.f32.mrb[37].mxu0 }
 0x1a8   : > { %v1936_v23 = vrot.slane %v1935_v17, 1  ;;  %v1915_v34 = vrot.slane %v1914_v52, 1  ;;  %v1769_v2 = vmul.f32 %v4487_v46, %v1664_v19  ;;  %v1768_v20 = vmul.f32 %v4500_v51, %v1505_v16  ;;  %v1666_v12 = vpop.f32.mrb[37].mxu1 }
 0x1a9   : > { %v1895_v43 = vadd.f32 %v1894_v21, %v1893_v1  ;;  %v1957_v9 = vrot.slane %v1956_v28, 1  ;;  %v1960_v8 = vadd.f32 %v1959_v60, %v1767_v40  ;;  %v1770_v55 = vmul.f32 %v4506_v47, %v1666_v12 }
 0x1aa   : > { %v1937_v13 = vadd.f32 %v1936_v23, %v1935_v17  ;;  %v1916_v25 = vadd.f32 %v1915_v34, %v1914_v52  ;;  %v2002_v48 = vadd.f32 %v2001_v58, %v1769_v2  ;;  %v1981_v18 = vadd.f32 %v1980_v62, %v1768_v20  ;;  %v1509_v41 = vpop.f32.mrb[38].mxu0  ;;  %v5193_v2 = vld [vmem:[#allocation29_spill] sm:$0xff] }
 0x1ab   : > { %v2099_v6 = vsub.f32 %v1895_v43, %v4509_v22  ;;  %v1958_v39 = vadd.f32 %v1957_v9, %v1956_v28  ;;  %v2023_v0 = vadd.f32 %v2022_v44, %v1770_v55  ;;  %v1775_v7 = vmul.f32 %v4517_v26, %v1509_v41  ;;  %v1670_v19 = vpop.f32.mrb[38].mxu1  ;;  %v1511_v46 = vpop.f32.mrb[39].mxu0  ;;  %v5195_v41 = vld [vmem:[#allocation23_spill] sm:$0xff] }
 0x1ac   : > { %v2101_v51 = vsub.f32 %v1937_v13, %v4511_v33  ;;  %v2100_v47 = vsub.f32 %v1916_v25, %v4529_v38  ;;  %v1777_v40 = vmul.f32 %v4523_v10, %v1670_v19  ;;  %v1776_v59 = vmul.f32 %v4544_v61, %v1511_v46  ;;  %v1672_v14 = vpop.f32.mrb[39].mxu1  ;;  %v5197_v46 = vld [vmem:[#allocation16_spill] sm:$0xff] }
 0x1ad   : > { %v2167_v22 = vmul.f32 %v2099_v6, %v2099_v6  ;;  %v2102_v26 = vsub.f32 %v1958_v39, %v4537_v35  ;;  %v1961_v1 = vadd.f32 %v1960_v8, %v1775_v7  ;;  %v1778_v56 = vmul.f32 %v4556_v54, %v1672_v14  ;;  %v5198_v14 = vld [vmem:[#allocation30_spill] sm:$0xff] }
 0x1ae   : > { %v2169_v33 = vmul.f32 %v2101_v51, %v2101_v51  ;;  %v2168_v60 = vmul.f32 %v2100_v47, %v2100_v47  ;;  %v2003_v38 = vadd.f32 %v2002_v48, %v1777_v40  ;;  %v1982_v57 = vadd.f32 %v1981_v18, %v1776_v59  ;;  %v1515_v10 = vpop.f32.mrb[40].mxu0 }
 0x1af   : > { %v2170_v17 = vmul.f32 %v2102_v26, %v2102_v26  ;;  %v2024_v61 = vadd.f32 %v2023_v0, %v1778_v56  ;;  %v1783_v52 = vmul.f32 %v4562_v36, %v1515_v10  ;;  %v1676_v58 = vpop.f32.mrb[40].mxu1  ;;  %v1517_v62 = vpop.f32.mrb[41].mxu0  ;;  %v223_v42 = vrot.slane %v4349_v24, %v3582_v32  ;;  %v5199_v26 = vld [vmem:[#allocation33_spill] sm:$0xff] }
 0x1b0   : > { %v2183_v21 = vcombine.low %v2167_v22, %v2168_v60  ;;  %v1785_v35 = vmul.f32 %v4570_v5, %v1676_v58  ;;  %v1784_v28 = vmul.f32 %v4580_v45, %v1517_v62  ;;  %v1678_v54 = vpop.f32.mrb[41].mxu1  ;;  %v219_v44 = vrot.slane %v4349_v24, %v3549_v29  ;;  %v5202_v62 = vld [vmem:[#allocation35_spill] sm:$0xff] }
 0x1b1   : > { %v2184_v16 = vcombine.low %v2169_v33, %v2170_v17  ;;  %v1962_v23 = vadd.f32 %v1961_v1, %v1783_v52  ;;  %v1786_v34 = vmul.f32 %v4586_v53, %v1678_v54  ;;  %v227_v36 = vrot.slane %v4349_v24, %v5193_v2  ;;  %v5201_v52 = vld [vmem:[#allocation24_spill] sm:$0xff] }
 0x1b2   : > { %v4769_v20 = vrot.slane %v2183_v21, %v4573_v30  ;;  %v2004_v12 = vadd.f32 %v2003_v38, %v1785_v35  ;;  %v1983_v43 = vadd.f32 %v1982_v57, %v1784_v28  ;;  %v1521_v9 = vpop.f32.mrb[42].mxu0  ;;  %v5194_v5 = vrot.slane %v4349_v24, %v3568_v31  ;;  %v5200_v38 = vld [vmem:[#allocation34_spill] sm:$0xff] }
 0x1b3   : > { %v4775_v45 = vrot.slane %v2184_v16, %v4573_v30  ;;  %v2025_v8 = vadd.f32 %v2024_v61, %v1786_v34  ;;  %v1791_v55 = vmul.f32 %v4601_v4, %v1521_v9  ;;  %v1682_v53 = vpop.f32.mrb[42].mxu1  ;;  %v1523_v13 = vpop.f32.mrb[43].mxu0  ;;  %vm371_vm8 = vcmp.eq.s32.totalorder %v4375_v63, %v5195_v41  ;;  %v5205_v9 = vld [vmem:[#allocation39_spill] sm:$0xff] }
 0x1b4   : > { %3026 = vlog2.f32 %v5194_v5  ;;  %v1793_v25 = vmul.f32 %v4612_v3, %v1682_v53  ;;  %v1792_v48 = vmul.f32 %v4621_v50, %v1523_v13  ;;  %v1684_v18 = vpop.f32.mrb[43].mxu1  ;;  %v5196_v19 = vmov 0.0  }
 0x1b5   : > { %3028 = vlog2.f32 %v223_v42  ;;  %v2215_v24 = vcombine.low %v4769_v20, %v4775_v45  ;;  %v1963_v6 = vadd.f32 %v1962_v23, %v1791_v55  ;;  %v1794_v39 = vmul.f32 %v4629_v37, %v1684_v18  ;;  %v5204_v23 = vld [vmem:[#allocation38_spill] sm:$0xff]  ;;  %v5222_v45 = vld [vmem:[#allocation13_spill] sm:$0xff] (!%p2795_p1) }
 0x1b6   : > { %3030 = vlog2.f32 %v219_v44  ;;  %v2005_v4 = vadd.f32 %v2004_v12, %v1793_v25  ;;  %v1984_v0 = vadd.f32 %v1983_v43, %v1792_v48  ;;  %v1527_v7 = vpop.f32.mrb[44].mxu0  ;;  %v4789_v3 = vsel %vm365_vm5, 1.0, %v5196_v19  ;;  %v5203_v44 = vld [vmem:[#allocation37_spill] sm:$0xff] }
 0x1b7   : > { %3032 = vlog2.f32 %v227_v36  ;;  %vm373_vm9 = vcmp.eq.s32.totalorder %v4382_v11, %v5195_v41  ;;  %v2026_v50 = vadd.f32 %v2025_v8, %v1794_v39  ;;  %v1799_v51 = vmul.f32 %v5197_v46, %v1527_v7  ;;  %v1688_v47 = vpop.f32.mrb[44].mxu1  ;;  %v1529_v40 = vpop.f32.mrb[45].mxu0 }
 0x1b8   : > { %v4798_v37 = vsel %vm364_vm6, 1.0, %v5196_v19  ;;  %v4804_v59 = vsel %vm366_vm7, 1.0, %v5196_v19  ;;  %v1801_v22 = vmul.f32 %v5198_v14, %v1688_v47  ;;  %v1800_v1 = vmul.f32 %v5199_v26, %v1529_v40  ;;  %v1690_v56 = vpop.f32.mrb[45].mxu1  ;;  %v5208_v47 = vld [vmem:[#allocation40_spill] sm:$0xff]  ;;  %v5209_v14 = vld [vmem:[#allocation41_spill] sm:$0xff] }
 0x1b9   : > { %v4812_v33 = vsel %vm371_vm8, 1.0, %v5196_v19  ;;  %vm372_vm10 = vcmp.eq.s32.totalorder %v4390_v49, %v5195_v41  ;;  %v1964_v60 = vadd.f32 %v1963_v6, %v1799_v51  ;;  %v1802_v57 = vmul.f32 %v5200_v38, %v1690_v56 }
 0x1ba   : > { %v4818_v27 = vsel %vm373_vm9, 1.0, %v5196_v19  ;;  %vm374_vm11 = vcmp.eq.s32.totalorder %v4398_v15, %v5195_v41  ;;  %v2006_v10 = vadd.f32 %v2005_v4, %v1801_v22  ;;  %v1985_v17 = vadd.f32 %v1984_v0, %v1800_v1  ;;  %v1533_v61 = vpop.f32.mrb[46].mxu0  ;;  %v5206_v41 = vld [vmem:[#allocation25_spill] sm:$0xff] }
 0x1bb   : > { %vm379_vm12 = vcmp.eq.s32.totalorder %v4375_v63, %v5201_v52  ;;  %vm381_vm13 = vcmp.eq.s32.totalorder %v4382_v11, %v5201_v52  ;;  %v2027_v58 = vadd.f32 %v2026_v50, %v1802_v57  ;;  %v1807_v42 = vmul.f32 %v5202_v62, %v1533_v61  ;;  %v1694_v21 = vpop.f32.mrb[46].mxu1  ;;  %v1535_v35 = vpop.f32.mrb[47].mxu0  ;;  %v5207_v4 = vld [vmem:[#allocation17_spill] sm:$0xff] }
 0x1bc   : > { %v4828_v28 = vsel %vm372_vm10, 1.0, %v5196_v19  ;;  %vm380_vm14 = vcmp.eq.s32.totalorder %v4390_v49, %v5201_v52  ;;  %v1809_v16 = vmul.f32 %v5203_v44, %v1694_v21  ;;  %v1808_v34 = vmul.f32 %v5204_v23, %v1535_v35  ;;  %v1696_v2 = vpop.f32.mrb[47].mxu1 }
 0x1bd   : > { %v4838_v36 = vsel %vm374_vm11, 1.0, %v5196_v19  ;;  %vm382_vm15 = vcmp.eq.s32.totalorder %v4398_v15, %v5201_v52  ;;  %v1965_v43 = vadd.f32 %v1964_v60, %v1807_v42  ;;  %v1810_v5 = vmul.f32 %v5205_v9, %v1696_v2  ;;  %v5210_v60 = vld [vmem:[#allocation42_spill] sm:$0xff]  ;;  %v5211_v42 = vld [vmem:[#allocation43_spill] sm:$0xff] }
 0x1be   : > { %v3027_v54 = vpop.eup %3026  ;;  %v4847_v8 = vsel %vm379_vm12, 1.0, %v5196_v19  ;;  %v4853_v55 = vsel %vm381_vm13, 1.0, %v5196_v19  ;;  %v2007_v13 = vadd.f32 %v2006_v10, %v1809_v16  ;;  %v1986_v25 = vadd.f32 %v1985_v17, %v1808_v34  ;;  %v1539_v48 = vpop.f32.mrb[48].mxu0 }
 0x1bf   : > { %v3029_v12 = vpop.eup %3028  ;;  %v4859_v18 = vsel %vm380_vm14, 1.0, %v5196_v19  ;;  %vm387_vm0 = vcmp.eq.s32.totalorder %v4375_v63, %v5206_v41  ;;  %v2028_v39 = vadd.f32 %v2027_v58, %v1810_v5  ;;  %v1815_v0 = vmul.f32 %v5207_v4, %v1539_v48  ;;  %v1700_v7 = vpop.f32.mrb[48].mxu1 }
 0x1c0   : > { %v3031_v53 = vpop.eup %3030  ;;  %v1541_v50 = vpop.f32.mrb[49].mxu0  ;;  %v4868_v46 = vsel %vm382_vm15, 1.0, %v5196_v19  ;;  %v4870_v51 = vmul.f32 0.6931472, %v3027_v54  ;;  %v1817_v40 = vmul.f32 %v5208_v47, %v1700_v7  ;;  %vm389_vm1 = vcmp.eq.s32.totalorder %v4382_v11, %v5206_v41 }
 0x1c1   : > { %v3033_v6 = vpop.eup %3032  ;;  %v1816_v22 = vmul.f32 %v5209_v14, %v1541_v50  ;;  %v1702_v26 = vpop.f32.mrb[49].mxu1  ;;  %v4876_v1 = vmul.f32 0.6931472, %v3029_v12  ;;  %v1966_v56 = vadd.f32 %v1965_v43, %v1815_v0  ;;  %v4880_v57 = vsel %vm387_vm0, 1.0, %v5196_v19 }
 0x1c2   : > { %v1818_v38 = vmul.f32 %v5210_v60, %v1702_v26  ;;  %v4882_v10 = vmul.f32 0.6931472, %v3031_v53  ;;  %v2008_v17 = vadd.f32 %v2007_v13, %v1817_v40  ;;  %v1545_v52 = vpop.f32.mrb[50].mxu0  ;;  %vm388_vm2 = vcmp.eq.s32.totalorder %v4390_v49, %v5206_v41 }
 0x1c3   : > { %v1987_v61 = vadd.f32 %v1986_v25, %v1816_v22  ;;  %v4886_v58 = vmul.f32 0.6931472, %v3033_v6  ;;  %v1823_v21 = vmul.f32 %v5211_v42, %v1545_v52  ;;  %v1706_v35 = vpop.f32.mrb[50].mxu1  ;;  %v1547_v54 = vpop.f32.mrb[51].mxu0  ;;  %v2505_v44 = vsel %vm389_vm1, 1.0, %v5196_v19  ;;  %v5212_v6 = vld [vmem:[#allocation26_spill] sm:$0xff] }
 0x1c4   : > { %v2029_v62 = vadd.f32 %v2028_v39, %v1818_v38  ;;  %v2791_v16 = vadd.f32 -4.6051702, %v4870_v51  ;;  %v1825_v23 = vmul.f32 %v4789_v3, %v1706_v35  ;;  %v1824_v34 = vmul.f32 %v4798_v37, %v1547_v54  ;;  %v1708_v2 = vpop.f32.mrb[51].mxu1 }
 0x1c5   : > { %vm390_vm3 = vcmp.eq.s32.totalorder %v4398_v15, %v5206_v41  ;;  %v2793_v12 = vadd.f32 -4.6051702, %v4876_v1  ;;  %v1967_v43 = vadd.f32 %v1966_v56, %v1823_v21  ;;  %v1826_v9 = vmul.f32 %v4804_v59, %v1708_v2 }
 0x1c6   : > { %v2504_v5 = vsel %vm388_vm2, 1.0, %v5196_v19  ;;  %v2792_v53 = vadd.f32 -4.6051702, %v4882_v10  ;;  %v2009_v13 = vadd.f32 %v2008_v17, %v1825_v23  ;;  %v1988_v25 = vadd.f32 %v1987_v61, %v1824_v34  ;;  %v1551_v48 = vpop.f32.mrb[52].mxu0 }
 0x1c7   : > { %vm395_vm4 = vcmp.eq.s32.totalorder %v4375_v63, %v5212_v6  ;;  %v2794_v3 = vadd.f32 -4.6051702, %v4886_v58  ;;  %v2030_v37 = vadd.f32 %v2029_v62, %v1826_v9  ;;  %v1831_v41 = vmul.f32 %v4812_v33, %v1551_v48  ;;  %v1712_v39 = vpop.f32.mrb[52].mxu1  ;;  %v1553_v4 = vpop.f32.mrb[53].mxu0  ;;  %v5213_v48 = vld [vmem:[#allocation27_spill] sm:$0xff] }
 0x1c8   : > { %v2506_v0 = vsel %vm390_vm3, 1.0, %v5196_v19  ;;  %v2071_v59 = vmul.f32 0.75, %v2791_v16  ;;  %v1833_v7 = vmul.f32 %v4818_v27, %v1712_v39  ;;  %v1832_v50 = vmul.f32 %v4828_v28, %v1553_v4  ;;  %v1714_v47 = vpop.f32.mrb[53].mxu1 }
 0x1c9   : > { %vm397_vm5 = vcmp.eq.s32.totalorder %v4382_v11, %v5212_v6  ;;  %v2073_v40 = vmul.f32 0.75, %v2793_v12  ;;  %v1968_v14 = vadd.f32 %v1967_v43, %v1831_v41  ;;  %v1834_v22 = vmul.f32 %v4838_v36, %v1714_v47 }
 0x1ca   : > { %v2511_v26 = vsel %vm395_vm4, 1.0, %v5196_v19  ;;  %v2072_v33 = vmul.f32 0.75, %v2792_v53  ;;  %v2010_v56 = vadd.f32 %v2009_v13, %v1833_v7  ;;  %v1989_v60 = vadd.f32 %v1988_v25, %v1832_v50  ;;  %v1557_v38 = vpop.f32.mrb[54].mxu0 }
 0x1cb   : > { %vm396_vm6 = vcmp.eq.s32.totalorder %v4390_v49, %v5212_v6  ;;  %v2074_v27 = vmul.f32 0.75, %v2794_v3  ;;  %v2031_v17 = vadd.f32 %v2030_v37, %v1834_v22  ;;  %v1839_v28 = vmul.f32 %v4847_v8, %v1557_v38  ;;  %v1718_v61 = vpop.f32.mrb[54].mxu1  ;;  %v1559_v52 = vpop.f32.mrb[55].mxu0 }
 0x1cc   : > { %vm398_vm7 = vcmp.eq.s32.totalorder %v4398_v15, %v5212_v6  ;;  %v2083_v62 = vmul.f32 1.442695, %v2071_v59  ;;  %v1841_v36 = vmul.f32 %v4853_v55, %v1718_v61  ;;  %v1840_v42 = vmul.f32 %v4859_v18, %v1559_v52  ;;  %v1720_v21 = vpop.f32.mrb[55].mxu1 }
 0x1cd   : > { %v2513_v35 = vsel %vm397_vm5, 1.0, %v5196_v19  ;;  %v2087_v54 = vmul.f32 1.442695, %v2073_v40  ;;  %v1969_v16 = vadd.f32 %v1968_v14, %v1839_v28  ;;  %v1842_v8 = vmul.f32 %v4868_v46, %v1720_v21 }
 0x1ce   : > { %v2512_v23 = vsel %vm396_vm6, 1.0, %v5196_v19  ;;  %v2085_v34 = vmul.f32 1.442695, %v2072_v33  ;;  %v2011_v2 = vadd.f32 %v2010_v56, %v1841_v36  ;;  %v1990_v12 = vadd.f32 %v1989_v60, %v1840_v42  ;;  %v1563_v43 = vpop.f32.mrb[56].mxu0  ;;  %v5214_v60 = vld [vmem:[#allocation28_spill] sm:$0xff] }
 0x1cf   : > { %v2514_v55 = vsel %vm398_vm7, 1.0, %v5196_v19  ;;  %v2089_v9 = vmul.f32 1.442695, %v2074_v27  ;;  %v2032_v18 = vadd.f32 %v2031_v17, %v1842_v8  ;;  %v1847_v53 = vmul.f32 %v4880_v57, %v1563_v43  ;;  %v1724_v13 = vpop.f32.mrb[56].mxu1  ;;  %v1565_v25 = vpop.f32.mrb[57].mxu0 }
 0x1d0   : > { %vm403_vm8 = vcmp.eq.s32.totalorder %v4375_v63, %v5213_v48  ;;  %3034 = vpow2.f32 %v2083_v62  ;;  %v1849_v6 = vmul.f32 %v2505_v44, %v1724_v13  ;;  %v1848_v46 = vmul.f32 %v2504_v5, %v1565_v25  ;;  %v1726_v3 = vpop.f32.mrb[57].mxu1  ;;  %v5215_v13 = vld [vmem:[#allocation31_spill] sm:$0xff] }
 0x1d1   : > { %vm405_vm9 = vcmp.eq.s32.totalorder %v4382_v11, %v5213_v48  ;;  %3036 = vpow2.f32 %v2087_v54  ;;  %v1970_v37 = vadd.f32 %v1969_v16, %v1847_v53  ;;  %v1850_v41 = vmul.f32 %v2506_v0, %v1726_v3 }
 0x1d2   : > { %vm404_vm10 = vcmp.eq.s32.totalorder %v4390_v49, %v5213_v48  ;;  %3038 = vpow2.f32 %v2085_v34  ;;  %v2012_v57 = vadd.f32 %v2011_v2, %v1849_v6  ;;  %v1991_v39 = vadd.f32 %v1990_v12, %v1848_v46  ;;  %v1569_v4 = vpop.f32.mrb[58].mxu0 }
 0x1d3   : > { %vm406_vm11 = vcmp.eq.s32.totalorder %v4398_v15, %v5213_v48  ;;  %3040 = vpow2.f32 %v2089_v9  ;;  %v2033_v44 = vadd.f32 %v2032_v18, %v1850_v41  ;;  %v1855_v5 = vmul.f32 %v2511_v26, %v1569_v4  ;;  %v1730_v59 = vpop.f32.mrb[58].mxu1  ;;  %v1571_v7 = vpop.f32.mrb[59].mxu0  ;;  %v5216_v48 = vld [vmem:[#allocation32_spill] sm:$0xff] }
 0x1d4   : > { %v2519_v0 = vsel %vm403_vm8, 1.0, %v5196_v19  ;;  %v1857_v50 = vmul.f32 %v2513_v35, %v1730_v59  ;;  %v1856_v47 = vmul.f32 %v2512_v23, %v1571_v7  ;;  %v1732_v40 = vpop.f32.mrb[59].mxu1  ;;  %v2521_v14 = vsel %vm405_vm9, 1.0, %v5196_v19  ;;  %v5217_v41 = vld [vmem:[#allocation36_spill] sm:$0xff] }
 0x1d5   : > { %v2520_v22 = vsel %vm404_vm10, 1.0, %v5196_v19  ;;  %v1971_v26 = vadd.f32 %v1970_v37, %v1855_v5  ;;  %v1858_v33 = vmul.f32 %v2514_v55, %v1732_v40  ;;  %v2522_v56 = vsel %vm406_vm11, 1.0, %v5196_v19 }
 0x1d6   : > { %vm411_vm12 = vcmp.eq.s32.totalorder %v4375_v63, %v5214_v60  ;;  %v2013_v38 = vadd.f32 %v2012_v57, %v1857_v50  ;;  %v1992_v27 = vadd.f32 %v1991_v39, %v1856_v47  ;;  %v1575_v17 = vpop.f32.mrb[60].mxu0  ;;  %vm413_vm13 = vcmp.eq.s32.totalorder %v4382_v11, %v5214_v60  ;;  %v5218_v39 = vld [vmem:[#allocation44_spill] sm:$0xff] }
 0x1d7   : > { %vm412_vm14 = vcmp.eq.s32.totalorder %v4390_v49, %v5214_v60  ;;  %v2034_v28 = vadd.f32 %v2033_v44, %v1858_v33  ;;  %v1863_v61 = vmul.f32 %v2519_v0, %v1575_v17  ;;  %v1736_v52 = vpop.f32.mrb[60].mxu1  ;;  %v1577_v62 = vpop.f32.mrb[61].mxu0  ;;  %vm414_vm15 = vcmp.eq.s32.totalorder %v4398_v15, %v5214_v60 }
 0x1d8   : > { %v1865_v36 = vmul.f32 %v2521_v14, %v1736_v52  ;;  %v1864_v42 = vmul.f32 %v2520_v22, %v1577_v62  ;;  %v1738_v21 = vpop.f32.mrb[61].mxu1  ;;  %v2527_v63 = vsel %vm411_vm12, 1.0, %v5196_v19  ;;  %v2529_v11 = vsel %vm413_vm13, 1.0, %v5196_v19 }
 0x1d9   : > { %v1972_v54 = vadd.f32 %v1971_v26, %v1863_v61  ;;  %v1866_v16 = vmul.f32 %v2522_v56, %v1738_v21  ;;  %v2528_v8 = vsel %vm412_vm14, 1.0, %v5196_v19  ;;  %v2530_v12 = vsel %vm414_vm15, 1.0, %v5196_v19 }
 0x1da   : > { %v3035_v35 = vpop.eup %3034  ;;  %v2014_v23 = vadd.f32 %v2013_v38, %v1865_v36  ;;  %v1993_v34 = vadd.f32 %v1992_v27, %v1864_v42  ;;  %v1581_v2 = vpop.f32.mrb[62].mxu0  ;;  %v2091_v25 = vmin.f32 %v5215_v13, 1.0  ;;  %v2093_v6 = vmin.f32 %v5216_v48, 1.0 }
 0x1db   : > { %v3037_v49 = vpop.eup %3036  ;;  %v2035_v15 = vadd.f32 %v2034_v28, %v1866_v16  ;;  %v1871_v55 = vmul.f32 %v2527_v63, %v1581_v2  ;;  %v1742_v9 = vpop.f32.mrb[62].mxu1  ;;  %v2092_v57 = vmin.f32 %v5217_v41, 1.0  ;;  %v2094_v4 = vmin.f32 %v5218_v39, 1.0 }
 0x1dc   : > { %v3039_v43 = vpop.eup %3038  ;;  %v1583_v18 = vpop.f32.mrb[63].mxu0  ;;  %v1873_v46 = vmul.f32 %v2529_v11, %v1742_v9  ;;  %v2095_v19 = vmin.f32 %v3035_v35, 1.0  ;;  %v2097_v7 = vmin.f32 %v3037_v49, 1.0  ;;  %vm2282_vm0 = vcmask (!%p2795_p1), 1040384  }
 0x1dd   : > { %v3041_v53 = vpop.eup %3040  ;;  %v1872_v3 = vmul.f32 %v2528_v8, %v1583_v18  ;;  %v1744_v37 = vpop.f32.mrb[63].mxu1  ;;  %v1973_v44 = vadd.f32 %v1972_v54, %v1871_v55  ;;  %v2096_v47 = vmin.f32 %v3039_v43, 1.0  ;;  %v2116_v60 = vcombine.low %v2091_v25, %v2092_v57 }
 0x1de   : > { %v1874_v5 = vmul.f32 %v2530_v12, %v1744_v37  ;;  %v2015_v59 = vadd.f32 %v2014_v23, %v1873_v46  ;;  %v2098_v14 = vmin.f32 %v3041_v53, 1.0  ;;  %v2117_v38 = vcombine.low %v2093_v6, %v2094_v4 }
 0x1df   : > { %v1994_v0 = vadd.f32 %v1993_v34, %v1872_v3  ;;  %v1974_v50 = vrot.slane %v1973_v44, 4  ;;  %v2118_v61 = vcombine.low %v2095_v19, %v2096_v47  ;;  %v2126_v35 = vrot.slane %v2116_v60, %v4573_v30  ;;  %v5220_v60 = vld [vmem:[#allocation12_spill] sm:$0xff] (!%p2795_p1) }
 0x1e0   : > { %v2036_v40 = vadd.f32 %v2035_v15, %v1874_v5  ;;  %v2016_v22 = vrot.slane %v2015_v59, 4  ;;  %v2119_v62 = vcombine.low %v2097_v7, %v2098_v14  ;;  %v2133_v54 = vrot.slane %v2117_v38, %v4573_v30  ;;  %v236_v5 = vld [vmem:[%s3336_s30 + $0x18] sm:$0xff] }
 0x1e1   : > { %v1995_v26 = vrot.slane %v1994_v0, 4  ;;  %v1975_v33 = vadd.f32 %v1974_v50, %v1973_v44  ;;  %v2140_v49 = vrot.slane %v2118_v61, %v4573_v30  ;;  %vm2308_vm1 = vcmask (!%p2795_p1), 0  }
 0x1e2   : > { %v2037_v56 = vrot.slane %v2036_v40, 4  ;;  %v2017_v27 = vadd.f32 %v2016_v22, %v2015_v59  ;;  %v2147_v34 = vrot.slane %v2119_v62, %v4573_v30  ;;  %v2148_v18 = vcombine.low %v2126_v35, %v2133_v54  ;;  %v5223_v54 = vld [vmem:[#allocation29_spill] sm:$0xff] (!%p2795_p1) }
 0x1e3   : > { %v1996_v17 = vadd.f32 %v1995_v26, %v1994_v0  ;;  %v1976_v28 = vrot.slane %v1975_v33, 2  ;;  %v237_v59 = vcvt.s32.f32 %v236_v5 }
 0x1e4   : > { %v2038_v52 = vadd.f32 %v2037_v56, %v2036_v40  ;;  %v2018_v36 = vrot.slane %v2017_v27, 2  ;;  %v2149_v25 = vcombine.low %v2140_v49, %v2147_v34  ;;  %v2156_v57 = vrot.slane %v2148_v18, %v4573_v30  ;;  %v2107_v40 = vld [vmem:[#allocation2] sm:$0xff] }
 0x1e5   : > { %v1997_v42 = vrot.slane %v1996_v17, 2  ;;  %v1977_v21 = vadd.f32 %v1976_v28, %v1975_v33  ;;  %v5219_v33 = vld [vmem:[#allocation14_spill] sm:$0xff] (!%p2795_p1) }
 0x1e6   : > { %v2039_v63 = vrot.slane %v2038_v52, 2  ;;  %v2019_v16 = vadd.f32 %v2018_v36, %v2017_v27  ;;  %v2163_v39 = vrot.slane %v2149_v25, %v4573_v30  ;;  %v5221_v27 = vld [vmem:[#allocation15_spill] sm:$0xff] (!%p2795_p1) }
 0x1e7   : > { %v1998_v11 = vadd.f32 %v1997_v42, %v1996_v17  ;;  %v1978_v8 = vrot.slane %v1977_v21, 1 }
 0x1e8   : > { %v2040_v23 = vadd.f32 %v2039_v63, %v2038_v52  ;;  %v2020_v2 = vrot.slane %v2019_v16, 1  ;;  %v2164_v7 = vcombine.low %v2156_v57, %v2163_v39 }
 0x1e9   : > { %v1999_v12 = vrot.slane %v1998_v11, 1  ;;  %v1979_v43 = vadd.f32 %v1978_v8, %v1977_v21 }
 0x1ea   : > { %v2041_v15 = vrot.slane %v2040_v23, 1  ;;  %v2021_v55 = vadd.f32 %v2020_v2, %v2019_v16  ;;  %v2166_v0 = vmul.f32 %v2164_v7, %v237_v59 }
 0x1eb   : > { %v2000_v9 = vadd.f32 %v1999_v12, %v1998_v11  ;;  %v2103_v53 = vsub.f32 %v1979_v43, %v4870_v51 }
 0x1ec   : > { %v2042_v13 = vadd.f32 %v2041_v15, %v2040_v23  ;;  %v2105_v48 = vsub.f32 %v2021_v55, %v4876_v1 }
 0x1ed   : > { %v2104_v6 = vsub.f32 %v2000_v9, %v4882_v10  ;;  %v2171_v46 = vmul.f32 %v2103_v53, %v2103_v53 }
 0x1ee   : > { %v2106_v3 = vsub.f32 %v2042_v13, %v4886_v58  ;;  %v2173_v37 = vmul.f32 %v2105_v48, %v2105_v48  ;;  %v2223_v58 = vrot.slane %v2215_v24, %v4573_v30 }
 0x1ef   : > { %v2172_v41 = vmul.f32 %v2104_v6, %v2104_v6 }
 0x1f0   : > { %v2174_v4 = vmul.f32 %v2106_v3, %v2106_v3 }
 0x1f1   : > { %v2185_v44 = vcombine.low %v2171_v46, %v2172_v41 }
 0x1f2   : > { %v2186_v19 = vcombine.low %v2173_v37, %v2174_v4 }
 0x1f3   : > { %v2207_v51 = vrot.slane %v2185_v44, %v4573_v30 }
 0x1f4   : > { %v2214_v1 = vrot.slane %v2186_v19, %v4573_v30 }
 0x1f6   : > { %v2216_v10 = vcombine.low %v2207_v51, %v2214_v1 }
 0x1f8   : > { %v2230_v50 = vrot.slane %v2216_v10, %v4573_v30 }
 0x1fa   : > { %v2231_v47 = vcombine.low %v2223_v58, %v2230_v50  ;;  %2239 = sbr.rel (%p2795_p1) target bundleno = 743 (0x2e7), region = 44 }
 0x1fc   : > { %v2233_v14 = vmul.f32 %v2231_v47, %v2166_v0 }
 0x1fe   : > { %v2234_v22 = vadd.f32 %v2233_v14, %v2107_v40 }
 0x200   : > { %2235 = vst [vmem:[#allocation2] sm:$0xff] %v2234_v22 }
 0x207   : > { %v2240_v26 = vld [vmem:[#allocation2] sm:$0xff] }
 0x208   : > { %v2245_v56 = vrot.slane %v2240_v26, %v5219_v33  ;;  %v2249_v38 = vrot.slane %v2240_v26, %v5220_v60  ;;  %v2253_v20 = vrot.slane %v2240_v26, %v5221_v27  ;;  %v2257_v24 = vrot.slane %v2240_v26, %v5222_v45 }
 0x209   : > { %v2261_v30 = vrot.slane %v2240_v26, %v3568_v31  ;;  %v2265_v62 = vrot.slane %v2240_v26, %v3549_v29  ;;  %v2269_v21 = vrot.slane %v2240_v26, %v3582_v32  ;;  %v2273_v16 = vrot.slane %v2240_v26, %v5223_v54 }
 0x20a   : > { %v2283_v17 = vsel %vm2282_vm0, %v2245_v56, 0.0  ;;  %v2284_v28 = vsel %vm2282_vm0, %v2249_v38, 0.0  ;;  %v2286_v61 = vsel %vm2282_vm0, %v2253_v20, 0.0  ;;  %v2288_v36 = vsel %vm2282_vm0, %v2257_v24, 0.0 }
 0x20b   : > { %v2285_v52 = vadd.f32 %v2284_v28, %v2283_v17  ;;  %v2290_v63 = vsel %vm2282_vm0, %v2261_v30, 0.0  ;;  %v2292_v31 = vsel %vm2282_vm0, %v2265_v62, 0.0  ;;  %v2294_v8 = vsel %vm2282_vm0, %v2269_v21, 0.0 }
 0x20c   : > { %v2296_v23 = vsel %vm2282_vm0, %v2273_v16, 0.0 }
 0x20d   : > { %v2287_v42 = vadd.f32 %v2286_v61, %v2285_v52 }
 0x20f   : > { %v2289_v35 = vadd.f32 %v2288_v36, %v2287_v42 }
 0x211   : > { %v2291_v11 = vadd.f32 %v2290_v63, %v2289_v35 }
 0x213   : > { %v2293_v49 = vadd.f32 %v2292_v31, %v2291_v11 }
 0x215   : > { %v2295_v34 = vadd.f32 %v2294_v8, %v2293_v49 }
 0x217   : > { %v2297_v29 = vadd.f32 %v2296_v23, %v2295_v34 }
 0x219   : > { %2298 = vadd.xlane.f32.xlu0 %v2297_v29 }
 0x2a6   : > { %v2299_v2 = vpop.xlane.xlu0 %2298 }
 0x2a7   : > { %v2300_v12 = vrot.slane %v2299_v2, 4 }
 0x2a9   : > { %v2301_v43 = vadd.f32 %v2300_v12, %v2299_v2 }
 0x2ab   : > { %v2302_v32 = vrot.slane %v2301_v43, 2 }
 0x2ad   : > { %v2303_v15 = vadd.f32 %v2302_v32, %v2301_v43 }
 0x2af   : > { %v2304_v55 = vrot.slane %v2303_v15, 1 }
 0x2b1   : > { %v2305_v9 = vadd.f32 %v2304_v55, %v2303_v15 }
 0x2b3   : > { %2929 = vpush %v2305_v9 }
 0x2e4   : > { %s2930_s12 = spop %2929 }
 0x2e5   : > { %v2307_v18 = vstv %s2930_s12 }
 0x2e6   : > { %2309 = vst.msk [vmem:[#allocation8] sm:$0x1] %vm2308_vm1, %v2307_v18 }
 0x2e7 PF: > { %p4999_p4 = scmp.eq.s32.totalorder %s2392_s15, 3  ;;  %s3194_s17 = smov [#allocation8]  }
 0x2e8   : > { %s2319_s18 = sshll.u32 %s3194_s17, 4  ;;  %s2320_s18 = int_to_ptr.vmem [resolvable:$true] %s2319_s18 }
 0x2e9   : > { %s3100_s20 = scalar_lea.vmem %s2320_s18, 16  ;;  %s3106_s27 = scalar_lea.vmem %s2320_s18, 32 }
 0x2ea   : > { %p3101_p5 = scmp.ne.s32.totalorder %s2320_s18, %s3100_s20  ;;  %p3107_p10 = scmp.lt.s32.totalorder %s2320_s18, %s2320_s18 }
 0x2eb   : > { %p3108_p11 = scmp.lt.s32.totalorder %s3106_s27, %s3100_s20 }
 0x2ec   : > { %p3102_p8 = pnand %p3101_p5, %p4999_p4 }
 0x2ed   : > { %p3109_p13 = por %p3108_p11, %p3107_p10 }
 0x2ee   : > { %p3103_p9 = pneg %p3102_p8 }
 0x2f0   : > { %p3110_p2 = pnand %p3109_p13, %p3103_p9 }
 0x2f2   : > { %3113 = shalt.err (!%p3110_p2)
}
 0x2f3   : > { %s3114_s29 = scalar_lea.hbm %s5045_s2, 16 }
 0x2f4   : > { %p3115_p3 = scmp.ne.s32.totalorder %s5045_s2, %s3114_s29  ;;  %p3120_p6 = scmp.lt.u32.totalorder %s3114_s29, %s5045_s2 }
 0x2f6   : > { %p3116_p0 = pnand %p3115_p3, %p4999_p4 }
 0x2f8   : > { %p3117_p12 = pneg %p3116_p0 }
 0x2fa   : > { %p3122_p7 = pnand %p3120_p6, %p3117_p12 }
 0x2fc   : > { %3125 = shalt.err (!%p3122_p7)
}
 0x2fd   : > { %2938 = dma.vmem_to_hbm [thread:$0]  (%p4999_p4), %s2320_s18, 16, %s5045_s2, [#allocation5]  }
 0x2fe   : > { %3159 = dma.done.wait (%p4999_p4), [#allocation5], 16  }
 0x2ff   : > { %3161 = vsyncadd (%p4999_p4), [#allocation5], 4294967280 }
 0x300 PF: > { %s17_s14 = sadd.s32 1, %s3184_s14   ;;  %s5225_s9 = smov %s3168_s10 }
 0x301   : > { %p14_p1 = scmp.ge.s32.totalorder %s17_s14, 6   ;;  %s5226_s10 = smov %s3172_s11 }
 0x302   : > { %s5227_s11 = smov %s3295_s24  ;;  %s5228_s12 = smov %s3180_s13 }
 0x303   : > { %s5229_s13 = smov %s5231_s22  ;;  %16 = sbr.rel (!%p14_p1) target bundleno = 6 (0x6), region = 78 }
 0x30a   :  { %2332 = vsyncpa [#allocation4], 1 }
 0x30b   :  { %2334 = vsyncpa [#allocation4 + $0x1], 1 }
 0x30c   :  { %2335 = vsyncpa [#allocation7], 1 }
 0x30d   :  { %2336 = vsyncpa [#allocation5], 1 }
 0x30e   :  { %2338 = vsyncpa [#allocation5 + $0x1], 1 }

</bundles_post_ra>
